<compile_context>
chip_gen: v7x
topology: tpu7x:2x2x1
jax: 0.10.0
libtpu: 0.0.40
codegen_flags: <defaults>
</compile_context>

<pallas_src>
import jax
import jax.numpy as jnp
from jax.experimental import pallas as pl
from jax.experimental.pallas import tpu as pltpu

# ----------------------------- hyperparameters ------------------------------
N = 2          # batch
T = 8          # sequence length
F = 32         # rnn_input_size
H = 32         # rnn_hidden_size
C = 16         # num_classes
CONTEXT = 3    # lookahead context
EPS = 1e-5     # BatchNorm eps (PyTorch default)


# --------------------------- fully fused forward kernel ----------------------
def _fused_forward_kernel(
    x_ref,            # (T*N, F)   time-major flattened input
    wih0_ref,         # (F, 4H)
    whh0_ref,         # (H, 4H)
    b0_ref,           # (1, 4H)    b_ih0 + b_hh0
    bn1_g_ref,        # (1, H)
    bn1_b_ref,        # (1, H)
    wih1_ref,         # (H, 4H)
    whh1_ref,         # (H, 4H)
    b1_ref,           # (1, 4H)
    law_ref,          # (CONTEXT, H)  depthwise lookahead taps
    fc_g_ref,         # (1, H)
    fc_b_ref,         # (1, H)
    fc_w_ref,         # (H, C)
    lsm_ref,          # out (T*N, C)  log_softmax, time-major
    sm_ref,           # out (T*N, C)  softmax, time-major
    seq_sc,           # scratch (T*N, H)
    pad_sc,           # scratch ((T+CONTEXT-1)*N, H)
):
    f32 = jnp.float32
    lane = jax.lax.broadcasted_iota(jnp.int32, (N, 4 * H), 1)
    tanh_lane = (lane >= 2 * H) & (lane < 3 * H)   # the "g" gate quarter (PyTorch i,f,g,o)

    def lstm_scan(proj, whh):
        """proj = hoisted x @ W_ih + bias, shape (T*N, 4H), time-major.

        Only h @ W_hh stays inside the serial recurrence. Returns list of (N, H)."""
        h = jnp.zeros((N, H), f32)
        c = jnp.zeros((N, H), f32)
        outs = []
        for t in range(T):                         # static unroll over time
            g = proj[t * N:(t + 1) * N, :] + jnp.dot(
                h, whh, preferred_element_type=f32)               # (N, 4H)
            a = jnp.where(tanh_lane, jnp.tanh(g), jax.nn.sigmoid(g))
            i_g = a[:, 0 * H:1 * H]
            f_g = a[:, 1 * H:2 * H]
            g_g = a[:, 2 * H:3 * H]
            o_g = a[:, 3 * H:4 * H]
            c = f_g * c + i_g * g_g
            h = o_g * jnp.tanh(c)
            outs.append(h)
        return outs

    def batchnorm(v, gamma, beta):
        # Training-mode BatchNorm1d over (rows, features): batch stats, biased variance.
        mean = jnp.mean(v, axis=0, keepdims=True)
        var = jnp.mean((v - mean) * (v - mean), axis=0, keepdims=True)
        return (v - mean) * jax.lax.rsqrt(var + EPS) * gamma + beta

    # ---- BatchRNN 0: LSTM (no batch norm); input projection hoisted ----
    x = x_ref[...].astype(f32)                                         # (T*N, F)
    proj0 = jnp.dot(x, wih0_ref[...], preferred_element_type=f32) + b0_ref[...]
    outs0 = lstm_scan(proj0, whh0_ref[...])
    for t in range(T):
        seq_sc[t * N:(t + 1) * N, :] = outs0[t]
    y0 = seq_sc[...]                                                   # (T*N, H)

    # ---- BatchRNN 1: SequenceWise BatchNorm1d(H) -> LSTM ----
    xb = batchnorm(y0, bn1_g_ref[...], bn1_b_ref[...])
    proj1 = jnp.dot(xb, wih1_ref[...], preferred_element_type=f32) + b1_ref[...]
    outs1 = lstm_scan(proj1, whh1_ref[...])

    # ---- Lookahead depthwise conv (right zero-pad in time) + Hardtanh(0, 20) ----
    pad_sc[T * N:(T + CONTEXT - 1) * N, :] = jnp.zeros(((CONTEXT - 1) * N, H), f32)
    for t in range(T):
        pad_sc[t * N:(t + 1) * N, :] = outs1[t]
    ypad = pad_sc[...]                                                 # ((T+CTX-1)*N, H)
    la = law_ref[0:1, :] * ypad[0:T * N, :]
    for k in range(1, CONTEXT):
        la = la + law_ref[k:k + 1, :] * ypad[k * N:k * N + T * N, :]
    la = jnp.clip(la, 0.0, 20.0)

    # ---- fc: SequenceWise(BatchNorm1d(H) -> Linear(H, C, bias=False)) ----
    xf = batchnorm(la, fc_g_ref[...], fc_b_ref[...])
    logits = jnp.dot(xf, fc_w_ref[...], preferred_element_type=f32)    # (T*N, C)

    # ---- softmax and log_softmax over the class dimension ----
    # Exact division (not approx reciprocal) so each softmax row sums to 1.0
    # to float rounding; the divide is over a tiny (T*N, C) tile.
    m = jnp.max(logits, axis=-1, keepdims=True)
    e = jnp.exp(logits - m)
    s = jnp.sum(e, axis=-1, keepdims=True)
    sm_ref[...] = (e / s).astype(sm_ref.dtype)
    lsm_ref[...] = ((logits - m) - jnp.log(s)).astype(lsm_ref.dtype)


# ------------------------------- full forward --------------------------------
@jax.jit
def model_forward(params, x, lengths):
    # x: (N, T, F); lengths assumed == T for all examples (see TODO at top).
    del lengths
    x_tm = jnp.transpose(x, (1, 0, 2)).reshape(T * N, F)   # time-major flatten (tiny XLA op)

    args = (
        x_tm,
        jnp.transpose(params["w_ih0"]),                              # (F, 4H)
        jnp.transpose(params["w_hh0"]),                              # (H, 4H)
        (params["b_ih0"] + params["b_hh0"]).reshape(1, 4 * H),
        params["bn1_gamma"].reshape(1, H),
        params["bn1_beta"].reshape(1, H),
        jnp.transpose(params["w_ih1"]),                              # (H, 4H)
        jnp.transpose(params["w_hh1"]),                              # (H, 4H)
        (params["b_ih1"] + params["b_hh1"]).reshape(1, 4 * H),
        jnp.transpose(params["la_w"]),                               # (CONTEXT, H)
        params["fc_gamma"].reshape(1, H),
        params["fc_beta"].reshape(1, H),
        jnp.transpose(params["fc_w"]),                               # (H, C)
    )

    lsm2d, sm2d = pl.pallas_call(
        _fused_forward_kernel,
        out_shape=(jax.ShapeDtypeStruct((T * N, C), jnp.float32),
                   jax.ShapeDtypeStruct((T * N, C), jnp.float32)),
        scratch_shapes=[
            pltpu.VMEM((T * N, H), jnp.float32),
            pltpu.VMEM(((T + CONTEXT - 1) * N, H), jnp.float32),
        ],
    )(*args)

    lsm = lsm2d.reshape(T, N, C)                            # (T, N, C)  log_softmax
    sm = jnp.transpose(sm2d.reshape(T, N, C), (1, 0, 2))    # (N, T, C)  softmax
    return lsm, sm


# ------------------------------ pure-JAX reference ----------------------------
def _reference_forward(params, x):
    def lstm_ref(xs, w_ih, w_hh, b_ih, b_hh):
        Hh = w_hh.shape[1]

        def step(carry, x_t):
            h, c = carry
            g = x_t @ w_ih.T + h @ w_hh.T + b_ih + b_hh
            i = jax.nn.sigmoid(g[:, 0 * Hh:1 * Hh])
            f = jax.nn.sigmoid(g[:, 1 * Hh:2 * Hh])
            gg = jnp.tanh(g[:, 2 * Hh:3 * Hh])
            o = jax.nn.sigmoid(g[:, 3 * Hh:4 * Hh])
            c = f * c + i * gg
            h = o * jnp.tanh(c)
            return (h, c), h

        nb = xs.shape[1]
        init = (jnp.zeros((nb, Hh), jnp.float32), jnp.zeros((nb, Hh), jnp.float32))
        _, ys = jax.lax.scan(step, init, xs)
        return ys

    def bn_ref(v, gamma, beta):
        m = jnp.mean(v, axis=0, keepdims=True)
        var = jnp.mean((v - m) ** 2, axis=0, keepdims=True)
        return (v - m) / jnp.sqrt(var + EPS) * gamma + beta

    xt = jnp.transpose(x, (1, 0, 2))
    y0 = lstm_ref(xt, params["w_ih0"], params["w_hh0"], params["b_ih0"], params["b_hh0"])
    y0b = bn_ref(y0.reshape(T * N, H), params["bn1_gamma"], params["bn1_beta"]).reshape(T, N, H)
    y1 = lstm_ref(y0b, params["w_ih1"], params["w_hh1"], params["b_ih1"], params["b_hh1"])
    ypad = jnp.concatenate([y1, jnp.zeros((CONTEXT - 1, N, H), jnp.float32)], axis=0)
    la = sum(ypad[k:k + T] * params["la_w"][:, k][None, None, :] for k in range(CONTEXT))
    la = jnp.clip(la, 0.0, 20.0)
    xf = bn_ref(la.reshape(T * N, H), params["fc_gamma"], params["fc_beta"])
    logits = (xf @ params["fc_w"].T).reshape(T, N, C)
    lsm = jax.nn.log_softmax(logits, axis=-1)
    sm = jax.nn.softmax(logits, axis=-1)
    return lsm, jnp.transpose(sm, (1, 0, 2))


def init_params(key):
    ks = jax.random.split(key, 10)
    s = 0.1
    return {
        # LSTM layer 0 (input F -> hidden H), PyTorch gate order (i, f, g, o)
        "w_ih0": jax.random.normal(ks[0], (4 * H, F), jnp.float32) * s,
        "w_hh0": jax.random.normal(ks[1], (4 * H, H), jnp.float32) * s,
        "b_ih0": jax.random.normal(ks[2], (4 * H,), jnp.float32) * s,
        "b_hh0": jax.random.normal(ks[3], (4 * H,), jnp.float32) * s,
        # BatchNorm before LSTM layer 1
        "bn1_gamma": jnp.ones((H,), jnp.float32),
        "bn1_beta": jnp.zeros((H,), jnp.float32),
        # LSTM layer 1 (hidden H -> hidden H)
        "w_ih1": jax.random.normal(ks[4], (4 * H, H), jnp.float32) * s,
        "w_hh1": jax.random.normal(ks[5], (4 * H, H), jnp.float32) * s,
        "b_ih1": jax.random.normal(ks[6], (4 * H,), jnp.float32) * s,
        "b_hh1": jax.random.normal(ks[7], (4 * H,), jnp.float32) * s,
        # Lookahead depthwise Conv1d weight, shape (H, 1, context) squeezed to (H, context)
        "la_w": jax.random.normal(ks[8], (H, CONTEXT), jnp.float32) * s,
        # fc: BatchNorm1d(H) + Linear(H, C, bias=False)
        "fc_gamma": jnp.ones((H,), jnp.float32),
        "fc_beta": jnp.zeros((H,), jnp.float32),
        "fc_w": jax.random.normal(ks[9], (C, H), jnp.float32) * s,
    }


if __name__ == "__main__":
    key = jax.random.PRNGKey(0)
    k_params, k_x = jax.random.split(key)
    params = init_params(k_params)

    x = jax.random.normal(k_x, (N, T, F), jnp.float32)       # (batch, time, features)
    lengths = jnp.full((N,), T, dtype=jnp.int32)

    log_probs, soft_probs = model_forward(params, x, lengths)
    jax.block_until_ready((log_probs, soft_probs))

    assert log_probs.shape == (T, N, C)
    assert soft_probs.shape == (N, T, C)
    assert bool(jnp.all(jnp.isfinite(log_probs)))
    # exact division in the softmax -> rows sum to 1 up to float rounding
    assert bool(jnp.allclose(jnp.sum(soft_probs, axis=-1), 1.0, atol=2e-3))

    # Compare against a pure-JAX reference (loose tolerance: MXU f32 passes)
    ref_lsm, ref_sm = _reference_forward(params, x)
    assert bool(jnp.allclose(log_probs, ref_lsm, atol=1e-2))
    assert bool(jnp.allclose(soft_probs, ref_sm, atol=1e-2))

    print("KERNEL_OK")
</pallas_src>

<mosaic_0001>
module attributes {stable_mosaic.version = 11 : i64} {
  func.func @_fused_forward_kernel(%arg0: memref<16x32xf32, #tpu.memory_space<vmem>>, %arg1: memref<32x128xf32, #tpu.memory_space<vmem>>, %arg2: memref<32x128xf32, #tpu.memory_space<vmem>>, %arg3: memref<1x128xf32, #tpu.memory_space<vmem>>, %arg4: memref<1x32xf32, #tpu.memory_space<vmem>>, %arg5: memref<1x32xf32, #tpu.memory_space<vmem>>, %arg6: memref<32x128xf32, #tpu.memory_space<vmem>>, %arg7: memref<32x128xf32, #tpu.memory_space<vmem>>, %arg8: memref<1x128xf32, #tpu.memory_space<vmem>>, %arg9: memref<3x32xf32, #tpu.memory_space<vmem>>, %arg10: memref<1x32xf32, #tpu.memory_space<vmem>>, %arg11: memref<1x32xf32, #tpu.memory_space<vmem>>, %arg12: memref<32x16xf32, #tpu.memory_space<vmem>>, %arg13: memref<16x16xf32, #tpu.memory_space<vmem>>, %arg14: memref<16x16xf32, #tpu.memory_space<vmem>>, %arg15: memref<16x32xf32, #tpu.memory_space<vmem>>, %arg16: memref<20x32xf32, #tpu.memory_space<vmem>>) attributes {dimension_semantics = [], scalar_prefetch = 0 : i64, scratch_operands = 2 : i64, tpu.core_type = #tpu.core_type<tc>} {
    %0 = tpu.iota {dimensions = array<i32: 1>} : vector<2x128xi32>
    %c64_i32 = arith.constant 64 : i32
    %1 = vector.broadcast %c64_i32 : i32 to vector<2x128xi32>
    %2 = arith.cmpi sge, %0, %1 : vector<2x128xi32>
    %c96_i32 = arith.constant 96 : i32
    %3 = vector.broadcast %c96_i32 : i32 to vector<2x128xi32>
    %4 = arith.cmpi slt, %0, %3 : vector<2x128xi32>
    %5 = arith.andi %2, %4 : vector<2x128xi1>
    %c0 = arith.constant 0 : index
    %c0_0 = arith.constant 0 : index
    %6 = vector.load %arg0[%c0, %c0_0] : memref<16x32xf32, #tpu.memory_space<vmem>>, vector<16x32xf32>
    %c0_1 = arith.constant 0 : index
    %c0_2 = arith.constant 0 : index
    %7 = vector.load %arg1[%c0_1, %c0_2] : memref<32x128xf32, #tpu.memory_space<vmem>>, vector<32x128xf32>
    %cst = arith.constant dense<0.000000e+00> : vector<16x128xf32>
    %8 = tpu.matmul %6, %7, %cst {dimension_numbers = #tpu.dot_dimension_numbers<[1], [0], [0], [1], [0, 0, 1, 1], [], []>} : vector<16x32xf32>, vector<32x128xf32>, vector<16x128xf32> -> vector<16x128xf32>
    %c0_3 = arith.constant 0 : index
    %c0_4 = arith.constant 0 : index
    %9 = vector.load %arg3[%c0_3, %c0_4] : memref<1x128xf32, #tpu.memory_space<vmem>>, vector<1x128xf32>
    %10 = vector.broadcast %9 : vector<1x128xf32> to vector<16x128xf32>
    %11 = arith.addf %8, %10 : vector<16x128xf32>
    %c0_5 = arith.constant 0 : index
    %c0_6 = arith.constant 0 : index
    %12 = vector.load %arg2[%c0_5, %c0_6] : memref<32x128xf32, #tpu.memory_space<vmem>>, vector<32x128xf32>
    %cst_7 = arith.constant 0.000000e+00 : f32
    %13 = vector.broadcast %cst_7 : f32 to vector<2x32xf32>
    %cst_8 = arith.constant 0.000000e+00 : f32
    %14 = vector.broadcast %cst_8 : f32 to vector<2x32xf32>
    %15 = vector.extract_strided_slice %11 {offsets = [0, 0], sizes = [2, 128], strides = [1, 1]} : vector<16x128xf32> to vector<2x128xf32>
    %cst_9 = arith.constant dense<0.000000e+00> : vector<2x128xf32>
    %16 = tpu.matmul %13, %12, %cst_9 {dimension_numbers = #tpu.dot_dimension_numbers<[1], [0], [0], [1], [0, 0, 1, 1], [], []>} : vector<2x32xf32>, vector<32x128xf32>, vector<2x128xf32> -> vector<2x128xf32>
    %17 = arith.addf %15, %16 : vector<2x128xf32>
    %18 = math.tanh %17 : vector<2x128xf32>
    %19 = arith.negf %17 : vector<2x128xf32>
    %20 = math.exp %19 : vector<2x128xf32>
    %cst_10 = arith.constant 1.000000e+00 : f32
    %21 = vector.broadcast %cst_10 : f32 to vector<2x128xf32>
    %22 = arith.addf %21, %20 : vector<2x128xf32>
    %23 = arith.divf %21, %22 : vector<2x128xf32>
    %24 = arith.select %5, %18, %23 : vector<2x128xi1>, vector<2x128xf32>
    %25 = vector.extract_strided_slice %24 {offsets = [0, 0], sizes = [2, 32], strides = [1, 1]} : vector<2x128xf32> to vector<2x32xf32>
    %26 = vector.extract_strided_slice %24 {offsets = [0, 32], sizes = [2, 32], strides = [1, 1]} : vector<2x128xf32> to vector<2x32xf32>
    %27 = vector.extract_strided_slice %24 {offsets = [0, 64], sizes = [2, 32], strides = [1, 1]} : vector<2x128xf32> to vector<2x32xf32>
    %28 = vector.extract_strided_slice %24 {offsets = [0, 96], sizes = [2, 32], strides = [1, 1]} : vector<2x128xf32> to vector<2x32xf32>
    %29 = arith.mulf %26, %14 : vector<2x32xf32>
    %30 = arith.mulf %25, %27 : vector<2x32xf32>
    %31 = arith.addf %29, %30 : vector<2x32xf32>
    %32 = math.tanh %31 : vector<2x32xf32>
    %33 = arith.mulf %28, %32 : vector<2x32xf32>
    %34 = vector.extract_strided_slice %11 {offsets = [2, 0], sizes = [2, 128], strides = [1, 1]} : vector<16x128xf32> to vector<2x128xf32>
    %cst_11 = arith.constant dense<0.000000e+00> : vector<2x128xf32>
    %35 = tpu.matmul %33, %12, %cst_11 {dimension_numbers = #tpu.dot_dimension_numbers<[1], [0], [0], [1], [0, 0, 1, 1], [], []>} : vector<2x32xf32>, vector<32x128xf32>, vector<2x128xf32> -> vector<2x128xf32>
    %36 = arith.addf %34, %35 : vector<2x128xf32>
    %37 = math.tanh %36 : vector<2x128xf32>
    %38 = arith.negf %36 : vector<2x128xf32>
    %39 = math.exp %38 : vector<2x128xf32>
    %cst_12 = arith.constant 1.000000e+00 : f32
    %40 = vector.broadcast %cst_12 : f32 to vector<2x128xf32>
    %41 = arith.addf %40, %39 : vector<2x128xf32>
    %42 = arith.divf %40, %41 : vector<2x128xf32>
    %43 = arith.select %5, %37, %42 : vector<2x128xi1>, vector<2x128xf32>
    %44 = vector.extract_strided_slice %43 {offsets = [0, 0], sizes = [2, 32], strides = [1, 1]} : vector<2x128xf32> to vector<2x32xf32>
    %45 = vector.extract_strided_slice %43 {offsets = [0, 32], sizes = [2, 32], strides = [1, 1]} : vector<2x128xf32> to vector<2x32xf32>
    %46 = vector.extract_strided_slice %43 {offsets = [0, 64], sizes = [2, 32], strides = [1, 1]} : vector<2x128xf32> to vector<2x32xf32>
    %47 = vector.extract_strided_slice %43 {offsets = [0, 96], sizes = [2, 32], strides = [1, 1]} : vector<2x128xf32> to vector<2x32xf32>
    %48 = arith.mulf %45, %31 : vector<2x32xf32>
    %49 = arith.mulf %44, %46 : vector<2x32xf32>
    %50 = arith.addf %48, %49 : vector<2x32xf32>
    %51 = math.tanh %50 : vector<2x32xf32>
    %52 = arith.mulf %47, %51 : vector<2x32xf32>
    %53 = vector.extract_strided_slice %11 {offsets = [4, 0], sizes = [2, 128], strides = [1, 1]} : vector<16x128xf32> to vector<2x128xf32>
    %cst_13 = arith.constant dense<0.000000e+00> : vector<2x128xf32>
    %54 = tpu.matmul %52, %12, %cst_13 {dimension_numbers = #tpu.dot_dimension_numbers<[1], [0], [0], [1], [0, 0, 1, 1], [], []>} : vector<2x32xf32>, vector<32x128xf32>, vector<2x128xf32> -> vector<2x128xf32>
    %55 = arith.addf %53, %54 : vector<2x128xf32>
    %56 = math.tanh %55 : vector<2x128xf32>
    %57 = arith.negf %55 : vector<2x128xf32>
    %58 = math.exp %57 : vector<2x128xf32>
    %cst_14 = arith.constant 1.000000e+00 : f32
    %59 = vector.broadcast %cst_14 : f32 to vector<2x128xf32>
    %60 = arith.addf %59, %58 : vector<2x128xf32>
    %61 = arith.divf %59, %60 : vector<2x128xf32>
    %62 = arith.select %5, %56, %61 : vector<2x128xi1>, vector<2x128xf32>
    %63 = vector.extract_strided_slice %62 {offsets = [0, 0], sizes = [2, 32], strides = [1, 1]} : vector<2x128xf32> to vector<2x32xf32>
    %64 = vector.extract_strided_slice %62 {offsets = [0, 32], sizes = [2, 32], strides = [1, 1]} : vector<2x128xf32> to vector<2x32xf32>
    %65 = vector.extract_strided_slice %62 {offsets = [0, 64], sizes = [2, 32], strides = [1, 1]} : vector<2x128xf32> to vector<2x32xf32>
    %66 = vector.extract_strided_slice %62 {offsets = [0, 96], sizes = [2, 32], strides = [1, 1]} : vector<2x128xf32> to vector<2x32xf32>
    %67 = arith.mulf %64, %50 : vector<2x32xf32>
    %68 = arith.mulf %63, %65 : vector<2x32xf32>
    %69 = arith.addf %67, %68 : vector<2x32xf32>
    %70 = math.tanh %69 : vector<2x32xf32>
    %71 = arith.mulf %66, %70 : vector<2x32xf32>
    %72 = vector.extract_strided_slice %11 {offsets = [6, 0], sizes = [2, 128], strides = [1, 1]} : vector<16x128xf32> to vector<2x128xf32>
    %cst_15 = arith.constant dense<0.000000e+00> : vector<2x128xf32>
    %73 = tpu.matmul %71, %12, %cst_15 {dimension_numbers = #tpu.dot_dimension_numbers<[1], [0], [0], [1], [0, 0, 1, 1], [], []>} : vector<2x32xf32>, vector<32x128xf32>, vector<2x128xf32> -> vector<2x128xf32>
    %74 = arith.addf %72, %73 : vector<2x128xf32>
    %75 = math.tanh %74 : vector<2x128xf32>
    %76 = arith.negf %74 : vector<2x128xf32>
    %77 = math.exp %76 : vector<2x128xf32>
    %cst_16 = arith.constant 1.000000e+00 : f32
    %78 = vector.broadcast %cst_16 : f32 to vector<2x128xf32>
    %79 = arith.addf %78, %77 : vector<2x128xf32>
    %80 = arith.divf %78, %79 : vector<2x128xf32>
    %81 = arith.select %5, %75, %80 : vector<2x128xi1>, vector<2x128xf32>
    %82 = vector.extract_strided_slice %81 {offsets = [0, 0], sizes = [2, 32], strides = [1, 1]} : vector<2x128xf32> to vector<2x32xf32>
    %83 = vector.extract_strided_slice %81 {offsets = [0, 32], sizes = [2, 32], strides = [1, 1]} : vector<2x128xf32> to vector<2x32xf32>
    %84 = vector.extract_strided_slice %81 {offsets = [0, 64], sizes = [2, 32], strides = [1, 1]} : vector<2x128xf32> to vector<2x32xf32>
    %85 = vector.extract_strided_slice %81 {offsets = [0, 96], sizes = [2, 32], strides = [1, 1]} : vector<2x128xf32> to vector<2x32xf32>
    %86 = arith.mulf %83, %69 : vector<2x32xf32>
    %87 = arith.mulf %82, %84 : vector<2x32xf32>
    %88 = arith.addf %86, %87 : vector<2x32xf32>
    %89 = math.tanh %88 : vector<2x32xf32>
    %90 = arith.mulf %85, %89 : vector<2x32xf32>
    %91 = vector.extract_strided_slice %11 {offsets = [8, 0], sizes = [2, 128], strides = [1, 1]} : vector<16x128xf32> to vector<2x128xf32>
    %cst_17 = arith.constant dense<0.000000e+00> : vector<2x128xf32>
    %92 = tpu.matmul %90, %12, %cst_17 {dimension_numbers = #tpu.dot_dimension_numbers<[1], [0], [0], [1], [0, 0, 1, 1], [], []>} : vector<2x32xf32>, vector<32x128xf32>, vector<2x128xf32> -> vector<2x128xf32>
    %93 = arith.addf %91, %92 : vector<2x128xf32>
    %94 = math.tanh %93 : vector<2x128xf32>
    %95 = arith.negf %93 : vector<2x128xf32>
    %96 = math.exp %95 : vector<2x128xf32>
    %cst_18 = arith.constant 1.000000e+00 : f32
    %97 = vector.broadcast %cst_18 : f32 to vector<2x128xf32>
    %98 = arith.addf %97, %96 : vector<2x128xf32>
    %99 = arith.divf %97, %98 : vector<2x128xf32>
    %100 = arith.select %5, %94, %99 : vector<2x128xi1>, vector<2x128xf32>
    %101 = vector.extract_strided_slice %100 {offsets = [0, 0], sizes = [2, 32], strides = [1, 1]} : vector<2x128xf32> to vector<2x32xf32>
    %102 = vector.extract_strided_slice %100 {offsets = [0, 32], sizes = [2, 32], strides = [1, 1]} : vector<2x128xf32> to vector<2x32xf32>
    %103 = vector.extract_strided_slice %100 {offsets = [0, 64], sizes = [2, 32], strides = [1, 1]} : vector<2x128xf32> to vector<2x32xf32>
    %104 = vector.extract_strided_slice %100 {offsets = [0, 96], sizes = [2, 32], strides = [1, 1]} : vector<2x128xf32> to vector<2x32xf32>
    %105 = arith.mulf %102, %88 : vector<2x32xf32>
    %106 = arith.mulf %101, %103 : vector<2x32xf32>
    %107 = arith.addf %105, %106 : vector<2x32xf32>
    %108 = math.tanh %107 : vector<2x32xf32>
    %109 = arith.mulf %104, %108 : vector<2x32xf32>
    %110 = vector.extract_strided_slice %11 {offsets = [10, 0], sizes = [2, 128], strides = [1, 1]} : vector<16x128xf32> to vector<2x128xf32>
    %cst_19 = arith.constant dense<0.000000e+00> : vector<2x128xf32>
    %111 = tpu.matmul %109, %12, %cst_19 {dimension_numbers = #tpu.dot_dimension_numbers<[1], [0], [0], [1], [0, 0, 1, 1], [], []>} : vector<2x32xf32>, vector<32x128xf32>, vector<2x128xf32> -> vector<2x128xf32>
    %112 = arith.addf %110, %111 : vector<2x128xf32>
    %113 = math.tanh %112 : vector<2x128xf32>
    %114 = arith.negf %112 : vector<2x128xf32>
    %115 = math.exp %114 : vector<2x128xf32>
    %cst_20 = arith.constant 1.000000e+00 : f32
    %116 = vector.broadcast %cst_20 : f32 to vector<2x128xf32>
    %117 = arith.addf %116, %115 : vector<2x128xf32>
    %118 = arith.divf %116, %117 : vector<2x128xf32>
    %119 = arith.select %5, %113, %118 : vector<2x128xi1>, vector<2x128xf32>
    %120 = vector.extract_strided_slice %119 {offsets = [0, 0], sizes = [2, 32], strides = [1, 1]} : vector<2x128xf32> to vector<2x32xf32>
    %121 = vector.extract_strided_slice %119 {offsets = [0, 32], sizes = [2, 32], strides = [1, 1]} : vector<2x128xf32> to vector<2x32xf32>
    %122 = vector.extract_strided_slice %119 {offsets = [0, 64], sizes = [2, 32], strides = [1, 1]} : vector<2x128xf32> to vector<2x32xf32>
    %123 = vector.extract_strided_slice %119 {offsets = [0, 96], sizes = [2, 32], strides = [1, 1]} : vector<2x128xf32> to vector<2x32xf32>
    %124 = arith.mulf %121, %107 : vector<2x32xf32>
    %125 = arith.mulf %120, %122 : vector<2x32xf32>
    %126 = arith.addf %124, %125 : vector<2x32xf32>
    %127 = math.tanh %126 : vector<2x32xf32>
    %128 = arith.mulf %123, %127 : vector<2x32xf32>
    %129 = vector.extract_strided_slice %11 {offsets = [12, 0], sizes = [2, 128], strides = [1, 1]} : vector<16x128xf32> to vector<2x128xf32>
    %cst_21 = arith.constant dense<0.000000e+00> : vector<2x128xf32>
    %130 = tpu.matmul %128, %12, %cst_21 {dimension_numbers = #tpu.dot_dimension_numbers<[1], [0], [0], [1], [0, 0, 1, 1], [], []>} : vector<2x32xf32>, vector<32x128xf32>, vector<2x128xf32> -> vector<2x128xf32>
    %131 = arith.addf %129, %130 : vector<2x128xf32>
    %132 = math.tanh %131 : vector<2x128xf32>
    %133 = arith.negf %131 : vector<2x128xf32>
    %134 = math.exp %133 : vector<2x128xf32>
    %cst_22 = arith.constant 1.000000e+00 : f32
    %135 = vector.broadcast %cst_22 : f32 to vector<2x128xf32>
    %136 = arith.addf %135, %134 : vector<2x128xf32>
    %137 = arith.divf %135, %136 : vector<2x128xf32>
    %138 = arith.select %5, %132, %137 : vector<2x128xi1>, vector<2x128xf32>
    %139 = vector.extract_strided_slice %138 {offsets = [0, 0], sizes = [2, 32], strides = [1, 1]} : vector<2x128xf32> to vector<2x32xf32>
    %140 = vector.extract_strided_slice %138 {offsets = [0, 32], sizes = [2, 32], strides = [1, 1]} : vector<2x128xf32> to vector<2x32xf32>
    %141 = vector.extract_strided_slice %138 {offsets = [0, 64], sizes = [2, 32], strides = [1, 1]} : vector<2x128xf32> to vector<2x32xf32>
    %142 = vector.extract_strided_slice %138 {offsets = [0, 96], sizes = [2, 32], strides = [1, 1]} : vector<2x128xf32> to vector<2x32xf32>
    %143 = arith.mulf %140, %126 : vector<2x32xf32>
    %144 = arith.mulf %139, %141 : vector<2x32xf32>
    %145 = arith.addf %143, %144 : vector<2x32xf32>
    %146 = math.tanh %145 : vector<2x32xf32>
    %147 = arith.mulf %142, %146 : vector<2x32xf32>
    %148 = vector.extract_strided_slice %11 {offsets = [14, 0], sizes = [2, 128], strides = [1, 1]} : vector<16x128xf32> to vector<2x128xf32>
    %cst_23 = arith.constant dense<0.000000e+00> : vector<2x128xf32>
    %149 = tpu.matmul %147, %12, %cst_23 {dimension_numbers = #tpu.dot_dimension_numbers<[1], [0], [0], [1], [0, 0, 1, 1], [], []>} : vector<2x32xf32>, vector<32x128xf32>, vector<2x128xf32> -> vector<2x128xf32>
    %150 = arith.addf %148, %149 : vector<2x128xf32>
    %151 = math.tanh %150 : vector<2x128xf32>
    %152 = arith.negf %150 : vector<2x128xf32>
    %153 = math.exp %152 : vector<2x128xf32>
    %cst_24 = arith.constant 1.000000e+00 : f32
    %154 = vector.broadcast %cst_24 : f32 to vector<2x128xf32>
    %155 = arith.addf %154, %153 : vector<2x128xf32>
    %156 = arith.divf %154, %155 : vector<2x128xf32>
    %157 = arith.select %5, %151, %156 : vector<2x128xi1>, vector<2x128xf32>
    %158 = vector.extract_strided_slice %157 {offsets = [0, 0], sizes = [2, 32], strides = [1, 1]} : vector<2x128xf32> to vector<2x32xf32>
    %159 = vector.extract_strided_slice %157 {offsets = [0, 32], sizes = [2, 32], strides = [1, 1]} : vector<2x128xf32> to vector<2x32xf32>
    %160 = vector.extract_strided_slice %157 {offsets = [0, 64], sizes = [2, 32], strides = [1, 1]} : vector<2x128xf32> to vector<2x32xf32>
    %161 = vector.extract_strided_slice %157 {offsets = [0, 96], sizes = [2, 32], strides = [1, 1]} : vector<2x128xf32> to vector<2x32xf32>
    %162 = arith.mulf %159, %145 : vector<2x32xf32>
    %163 = arith.mulf %158, %160 : vector<2x32xf32>
    %164 = arith.addf %162, %163 : vector<2x32xf32>
    %165 = math.tanh %164 : vector<2x32xf32>
    %166 = arith.mulf %161, %165 : vector<2x32xf32>
    %c0_25 = arith.constant 0 : index
    %c0_26 = arith.constant 0 : index
    %167 = vector.load %arg15[%c0_25, %c0_26] : memref<16x32xf32, #tpu.memory_space<vmem>>, vector<2x32xf32>
    tpu.vector_store %arg15[%c0_25, %c0_26], %33 {strides = array<i32>} : memref<16x32xf32, #tpu.memory_space<vmem>>, vector<2x32xf32>,
    %c2 = arith.constant 2 : index
    %c0_27 = arith.constant 0 : index
    %168 = vector.load %arg15[%c2, %c0_27] : memref<16x32xf32, #tpu.memory_space<vmem>>, vector<2x32xf32>
    tpu.vector_store %arg15[%c2, %c0_27], %52 {strides = array<i32>} : memref<16x32xf32, #tpu.memory_space<vmem>>, vector<2x32xf32>,
    %c4 = arith.constant 4 : index
    %c0_28 = arith.constant 0 : index
    %169 = vector.load %arg15[%c4, %c0_28] : memref<16x32xf32, #tpu.memory_space<vmem>>, vector<2x32xf32>
    tpu.vector_store %arg15[%c4, %c0_28], %71 {strides = array<i32>} : memref<16x32xf32, #tpu.memory_space<vmem>>, vector<2x32xf32>,
    %c6 = arith.constant 6 : index
    %c0_29 = arith.constant 0 : index
    %170 = vector.load %arg15[%c6, %c0_29] : memref<16x32xf32, #tpu.memory_space<vmem>>, vector<2x32xf32>
    tpu.vector_store %arg15[%c6, %c0_29], %90 {strides = array<i32>} : memref<16x32xf32, #tpu.memory_space<vmem>>, vector<2x32xf32>,
    %c8 = arith.constant 8 : index
    %c0_30 = arith.constant 0 : index
    %171 = vector.load %arg15[%c8, %c0_30] : memref<16x32xf32, #tpu.memory_space<vmem>>, vector<2x32xf32>
    tpu.vector_store %arg15[%c8, %c0_30], %109 {strides = array<i32>} : memref<16x32xf32, #tpu.memory_space<vmem>>, vector<2x32xf32>,
    %c10 = arith.constant 10 : index
    %c0_31 = arith.constant 0 : index
    %172 = vector.load %arg15[%c10, %c0_31] : memref<16x32xf32, #tpu.memory_space<vmem>>, vector<2x32xf32>
    tpu.vector_store %arg15[%c10, %c0_31], %128 {strides = array<i32>} : memref<16x32xf32, #tpu.memory_space<vmem>>, vector<2x32xf32>,
    %c12 = arith.constant 12 : index
    %c0_32 = arith.constant 0 : index
    %173 = vector.load %arg15[%c12, %c0_32] : memref<16x32xf32, #tpu.memory_space<vmem>>, vector<2x32xf32>
    tpu.vector_store %arg15[%c12, %c0_32], %147 {strides = array<i32>} : memref<16x32xf32, #tpu.memory_space<vmem>>, vector<2x32xf32>,
    %c14 = arith.constant 14 : index
    %c0_33 = arith.constant 0 : index
    %174 = vector.load %arg15[%c14, %c0_33] : memref<16x32xf32, #tpu.memory_space<vmem>>, vector<2x32xf32>
    tpu.vector_store %arg15[%c14, %c0_33], %166 {strides = array<i32>} : memref<16x32xf32, #tpu.memory_space<vmem>>, vector<2x32xf32>,
    %c0_34 = arith.constant 0 : index
    %c0_35 = arith.constant 0 : index
    %175 = vector.load %arg15[%c0_34, %c0_35] : memref<16x32xf32, #tpu.memory_space<vmem>>, vector<16x32xf32>
    %c0_36 = arith.constant 0 : index
    %c0_37 = arith.constant 0 : index
    %176 = vector.load %arg4[%c0_36, %c0_37] : memref<1x32xf32, #tpu.memory_space<vmem>>, vector<1x32xf32>
    %c0_38 = arith.constant 0 : index
    %c0_39 = arith.constant 0 : index
    %177 = vector.load %arg5[%c0_38, %c0_39] : memref<1x32xf32, #tpu.memory_space<vmem>>, vector<1x32xf32>
    %cst_40 = arith.constant dense<0.000000e+00> : vector<32xf32>
    %178 = vector.multi_reduction <add>, %175, %cst_40 [0] : vector<16x32xf32> to vector<32xf32>
    %179 = vector.shape_cast %178 : vector<32xf32> to vector<1x32xf32>
    %cst_41 = arith.constant 1.600000e+01 : f32
    %180 = vector.broadcast %cst_41 : f32 to vector<1x32xf32>
    %181 = arith.divf %179, %180 : vector<1x32xf32>
    %182 = vector.broadcast %181 : vector<1x32xf32> to vector<16x32xf32>
    %183 = arith.subf %175, %182 : vector<16x32xf32>
    %184 = vector.broadcast %181 : vector<1x32xf32> to vector<16x32xf32>
    %185 = arith.subf %175, %184 : vector<16x32xf32>
    %186 = arith.mulf %183, %185 : vector<16x32xf32>
    %cst_42 = arith.constant dense<0.000000e+00> : vector<32xf32>
    %187 = vector.multi_reduction <add>, %186, %cst_42 [0] : vector<16x32xf32> to vector<32xf32>
    %188 = vector.shape_cast %187 : vector<32xf32> to vector<1x32xf32>
    %cst_43 = arith.constant 1.600000e+01 : f32
    %189 = vector.broadcast %cst_43 : f32 to vector<1x32xf32>
    %190 = arith.divf %188, %189 : vector<1x32xf32>
    %191 = vector.broadcast %181 : vector<1x32xf32> to vector<16x32xf32>
    %192 = arith.subf %175, %191 : vector<16x32xf32>
    %cst_44 = arith.constant 9.99999974E-6 : f32
    %193 = vector.broadcast %cst_44 : f32 to vector<1x32xf32>
    %194 = arith.addf %190, %193 : vector<1x32xf32>
    %195 = math.rsqrt %194 : vector<1x32xf32>
    %196 = vector.broadcast %195 : vector<1x32xf32> to vector<16x32xf32>
    %197 = arith.mulf %192, %196 : vector<16x32xf32>
    %198 = vector.broadcast %176 : vector<1x32xf32> to vector<16x32xf32>
    %199 = arith.mulf %197, %198 : vector<16x32xf32>
    %200 = vector.broadcast %177 : vector<1x32xf32> to vector<16x32xf32>
    %201 = arith.addf %199, %200 : vector<16x32xf32>
    %c0_45 = arith.constant 0 : index
    %c0_46 = arith.constant 0 : index
    %202 = vector.load %arg6[%c0_45, %c0_46] : memref<32x128xf32, #tpu.memory_space<vmem>>, vector<32x128xf32>
    %cst_47 = arith.constant dense<0.000000e+00> : vector<16x128xf32>
    %203 = tpu.matmul %201, %202, %cst_47 {dimension_numbers = #tpu.dot_dimension_numbers<[1], [0], [0], [1], [0, 0, 1, 1], [], []>} : vector<16x32xf32>, vector<32x128xf32>, vector<16x128xf32> -> vector<16x128xf32>
    %c0_48 = arith.constant 0 : index
    %c0_49 = arith.constant 0 : index
    %204 = vector.load %arg8[%c0_48, %c0_49] : memref<1x128xf32, #tpu.memory_space<vmem>>, vector<1x128xf32>
    %205 = vector.broadcast %204 : vector<1x128xf32> to vector<16x128xf32>
    %206 = arith.addf %203, %205 : vector<16x128xf32>
    %c0_50 = arith.constant 0 : index
    %c0_51 = arith.constant 0 : index
    %207 = vector.load %arg7[%c0_50, %c0_51] : memref<32x128xf32, #tpu.memory_space<vmem>>, vector<32x128xf32>
    %cst_52 = arith.constant 0.000000e+00 : f32
    %208 = vector.broadcast %cst_52 : f32 to vector<2x32xf32>
    %cst_53 = arith.constant 0.000000e+00 : f32
    %209 = vector.broadcast %cst_53 : f32 to vector<2x32xf32>
    %210 = vector.extract_strided_slice %206 {offsets = [0, 0], sizes = [2, 128], strides = [1, 1]} : vector<16x128xf32> to vector<2x128xf32>
    %cst_54 = arith.constant dense<0.000000e+00> : vector<2x128xf32>
    %211 = tpu.matmul %208, %207, %cst_54 {dimension_numbers = #tpu.dot_dimension_numbers<[1], [0], [0], [1], [0, 0, 1, 1], [], []>} : vector<2x32xf32>, vector<32x128xf32>, vector<2x128xf32> -> vector<2x128xf32>
    %212 = arith.addf %210, %211 : vector<2x128xf32>
    %213 = math.tanh %212 : vector<2x128xf32>
    %214 = arith.negf %212 : vector<2x128xf32>
    %215 = math.exp %214 : vector<2x128xf32>
    %cst_55 = arith.constant 1.000000e+00 : f32
    %216 = vector.broadcast %cst_55 : f32 to vector<2x128xf32>
    %217 = arith.addf %216, %215 : vector<2x128xf32>
    %218 = arith.divf %216, %217 : vector<2x128xf32>
    %219 = arith.select %5, %213, %218 : vector<2x128xi1>, vector<2x128xf32>
    %220 = vector.extract_strided_slice %219 {offsets = [0, 0], sizes = [2, 32], strides = [1, 1]} : vector<2x128xf32> to vector<2x32xf32>
    %221 = vector.extract_strided_slice %219 {offsets = [0, 32], sizes = [2, 32], strides = [1, 1]} : vector<2x128xf32> to vector<2x32xf32>
    %222 = vector.extract_strided_slice %219 {offsets = [0, 64], sizes = [2, 32], strides = [1, 1]} : vector<2x128xf32> to vector<2x32xf32>
    %223 = vector.extract_strided_slice %219 {offsets = [0, 96], sizes = [2, 32], strides = [1, 1]} : vector<2x128xf32> to vector<2x32xf32>
    %224 = arith.mulf %221, %209 : vector<2x32xf32>
    %225 = arith.mulf %220, %222 : vector<2x32xf32>
    %226 = arith.addf %224, %225 : vector<2x32xf32>
    %227 = math.tanh %226 : vector<2x32xf32>
    %228 = arith.mulf %223, %227 : vector<2x32xf32>
    %229 = vector.extract_strided_slice %206 {offsets = [2, 0], sizes = [2, 128], strides = [1, 1]} : vector<16x128xf32> to vector<2x128xf32>
    %cst_56 = arith.constant dense<0.000000e+00> : vector<2x128xf32>
    %230 = tpu.matmul %228, %207, %cst_56 {dimension_numbers = #tpu.dot_dimension_numbers<[1], [0], [0], [1], [0, 0, 1, 1], [], []>} : vector<2x32xf32>, vector<32x128xf32>, vector<2x128xf32> -> vector<2x128xf32>
    %231 = arith.addf %229, %230 : vector<2x128xf32>
    %232 = math.tanh %231 : vector<2x128xf32>
    %233 = arith.negf %231 : vector<2x128xf32>
    %234 = math.exp %233 : vector<2x128xf32>
    %cst_57 = arith.constant 1.000000e+00 : f32
    %235 = vector.broadcast %cst_57 : f32 to vector<2x128xf32>
    %236 = arith.addf %235, %234 : vector<2x128xf32>
    %237 = arith.divf %235, %236 : vector<2x128xf32>
    %238 = arith.select %5, %232, %237 : vector<2x128xi1>, vector<2x128xf32>
    %239 = vector.extract_strided_slice %238 {offsets = [0, 0], sizes = [2, 32], strides = [1, 1]} : vector<2x128xf32> to vector<2x32xf32>
    %240 = vector.extract_strided_slice %238 {offsets = [0, 32], sizes = [2, 32], strides = [1, 1]} : vector<2x128xf32> to vector<2x32xf32>
    %241 = vector.extract_strided_slice %238 {offsets = [0, 64], sizes = [2, 32], strides = [1, 1]} : vector<2x128xf32> to vector<2x32xf32>
    %242 = vector.extract_strided_slice %238 {offsets = [0, 96], sizes = [2, 32], strides = [1, 1]} : vector<2x128xf32> to vector<2x32xf32>
    %243 = arith.mulf %240, %226 : vector<2x32xf32>
    %244 = arith.mulf %239, %241 : vector<2x32xf32>
    %245 = arith.addf %243, %244 : vector<2x32xf32>
    %246 = math.tanh %245 : vector<2x32xf32>
    %247 = arith.mulf %242, %246 : vector<2x32xf32>
    %248 = vector.extract_strided_slice %206 {offsets = [4, 0], sizes = [2, 128], strides = [1, 1]} : vector<16x128xf32> to vector<2x128xf32>
    %cst_58 = arith.constant dense<0.000000e+00> : vector<2x128xf32>
    %249 = tpu.matmul %247, %207, %cst_58 {dimension_numbers = #tpu.dot_dimension_numbers<[1], [0], [0], [1], [0, 0, 1, 1], [], []>} : vector<2x32xf32>, vector<32x128xf32>, vector<2x128xf32> -> vector<2x128xf32>
    %250 = arith.addf %248, %249 : vector<2x128xf32>
    %251 = math.tanh %250 : vector<2x128xf32>
    %252 = arith.negf %250 : vector<2x128xf32>
    %253 = math.exp %252 : vector<2x128xf32>
    %cst_59 = arith.constant 1.000000e+00 : f32
    %254 = vector.broadcast %cst_59 : f32 to vector<2x128xf32>
    %255 = arith.addf %254, %253 : vector<2x128xf32>
    %256 = arith.divf %254, %255 : vector<2x128xf32>
    %257 = arith.select %5, %251, %256 : vector<2x128xi1>, vector<2x128xf32>
    %258 = vector.extract_strided_slice %257 {offsets = [0, 0], sizes = [2, 32], strides = [1, 1]} : vector<2x128xf32> to vector<2x32xf32>
    %259 = vector.extract_strided_slice %257 {offsets = [0, 32], sizes = [2, 32], strides = [1, 1]} : vector<2x128xf32> to vector<2x32xf32>
    %260 = vector.extract_strided_slice %257 {offsets = [0, 64], sizes = [2, 32], strides = [1, 1]} : vector<2x128xf32> to vector<2x32xf32>
    %261 = vector.extract_strided_slice %257 {offsets = [0, 96], sizes = [2, 32], strides = [1, 1]} : vector<2x128xf32> to vector<2x32xf32>
    %262 = arith.mulf %259, %245 : vector<2x32xf32>
    %263 = arith.mulf %258, %260 : vector<2x32xf32>
    %264 = arith.addf %262, %263 : vector<2x32xf32>
    %265 = math.tanh %264 : vector<2x32xf32>
    %266 = arith.mulf %261, %265 : vector<2x32xf32>
    %267 = vector.extract_strided_slice %206 {offsets = [6, 0], sizes = [2, 128], strides = [1, 1]} : vector<16x128xf32> to vector<2x128xf32>
    %cst_60 = arith.constant dense<0.000000e+00> : vector<2x128xf32>
    %268 = tpu.matmul %266, %207, %cst_60 {dimension_numbers = #tpu.dot_dimension_numbers<[1], [0], [0], [1], [0, 0, 1, 1], [], []>} : vector<2x32xf32>, vector<32x128xf32>, vector<2x128xf32> -> vector<2x128xf32>
    %269 = arith.addf %267, %268 : vector<2x128xf32>
    %270 = math.tanh %269 : vector<2x128xf32>
    %271 = arith.negf %269 : vector<2x128xf32>
    %272 = math.exp %271 : vector<2x128xf32>
    %cst_61 = arith.constant 1.000000e+00 : f32
    %273 = vector.broadcast %cst_61 : f32 to vector<2x128xf32>
    %274 = arith.addf %273, %272 : vector<2x128xf32>
    %275 = arith.divf %273, %274 : vector<2x128xf32>
    %276 = arith.select %5, %270, %275 : vector<2x128xi1>, vector<2x128xf32>
    %277 = vector.extract_strided_slice %276 {offsets = [0, 0], sizes = [2, 32], strides = [1, 1]} : vector<2x128xf32> to vector<2x32xf32>
    %278 = vector.extract_strided_slice %276 {offsets = [0, 32], sizes = [2, 32], strides = [1, 1]} : vector<2x128xf32> to vector<2x32xf32>
    %279 = vector.extract_strided_slice %276 {offsets = [0, 64], sizes = [2, 32], strides = [1, 1]} : vector<2x128xf32> to vector<2x32xf32>
    %280 = vector.extract_strided_slice %276 {offsets = [0, 96], sizes = [2, 32], strides = [1, 1]} : vector<2x128xf32> to vector<2x32xf32>
    %281 = arith.mulf %278, %264 : vector<2x32xf32>
    %282 = arith.mulf %277, %279 : vector<2x32xf32>
    %283 = arith.addf %281, %282 : vector<2x32xf32>
    %284 = math.tanh %283 : vector<2x32xf32>
    %285 = arith.mulf %280, %284 : vector<2x32xf32>
    %286 = vector.extract_strided_slice %206 {offsets = [8, 0], sizes = [2, 128], strides = [1, 1]} : vector<16x128xf32> to vector<2x128xf32>
    %cst_62 = arith.constant dense<0.000000e+00> : vector<2x128xf32>
    %287 = tpu.matmul %285, %207, %cst_62 {dimension_numbers = #tpu.dot_dimension_numbers<[1], [0], [0], [1], [0, 0, 1, 1], [], []>} : vector<2x32xf32>, vector<32x128xf32>, vector<2x128xf32> -> vector<2x128xf32>
    %288 = arith.addf %286, %287 : vector<2x128xf32>
    %289 = math.tanh %288 : vector<2x128xf32>
    %290 = arith.negf %288 : vector<2x128xf32>
    %291 = math.exp %290 : vector<2x128xf32>
    %cst_63 = arith.constant 1.000000e+00 : f32
    %292 = vector.broadcast %cst_63 : f32 to vector<2x128xf32>
    %293 = arith.addf %292, %291 : vector<2x128xf32>
    %294 = arith.divf %292, %293 : vector<2x128xf32>
    %295 = arith.select %5, %289, %294 : vector<2x128xi1>, vector<2x128xf32>
    %296 = vector.extract_strided_slice %295 {offsets = [0, 0], sizes = [2, 32], strides = [1, 1]} : vector<2x128xf32> to vector<2x32xf32>
    %297 = vector.extract_strided_slice %295 {offsets = [0, 32], sizes = [2, 32], strides = [1, 1]} : vector<2x128xf32> to vector<2x32xf32>
    %298 = vector.extract_strided_slice %295 {offsets = [0, 64], sizes = [2, 32], strides = [1, 1]} : vector<2x128xf32> to vector<2x32xf32>
    %299 = vector.extract_strided_slice %295 {offsets = [0, 96], sizes = [2, 32], strides = [1, 1]} : vector<2x128xf32> to vector<2x32xf32>
    %300 = arith.mulf %297, %283 : vector<2x32xf32>
    %301 = arith.mulf %296, %298 : vector<2x32xf32>
    %302 = arith.addf %300, %301 : vector<2x32xf32>
    %303 = math.tanh %302 : vector<2x32xf32>
    %304 = arith.mulf %299, %303 : vector<2x32xf32>
    %305 = vector.extract_strided_slice %206 {offsets = [10, 0], sizes = [2, 128], strides = [1, 1]} : vector<16x128xf32> to vector<2x128xf32>
    %cst_64 = arith.constant dense<0.000000e+00> : vector<2x128xf32>
    %306 = tpu.matmul %304, %207, %cst_64 {dimension_numbers = #tpu.dot_dimension_numbers<[1], [0], [0], [1], [0, 0, 1, 1], [], []>} : vector<2x32xf32>, vector<32x128xf32>, vector<2x128xf32> -> vector<2x128xf32>
    %307 = arith.addf %305, %306 : vector<2x128xf32>
    %308 = math.tanh %307 : vector<2x128xf32>
    %309 = arith.negf %307 : vector<2x128xf32>
    %310 = math.exp %309 : vector<2x128xf32>
    %cst_65 = arith.constant 1.000000e+00 : f32
    %311 = vector.broadcast %cst_65 : f32 to vector<2x128xf32>
    %312 = arith.addf %311, %310 : vector<2x128xf32>
    %313 = arith.divf %311, %312 : vector<2x128xf32>
    %314 = arith.select %5, %308, %313 : vector<2x128xi1>, vector<2x128xf32>
    %315 = vector.extract_strided_slice %314 {offsets = [0, 0], sizes = [2, 32], strides = [1, 1]} : vector<2x128xf32> to vector<2x32xf32>
    %316 = vector.extract_strided_slice %314 {offsets = [0, 32], sizes = [2, 32], strides = [1, 1]} : vector<2x128xf32> to vector<2x32xf32>
    %317 = vector.extract_strided_slice %314 {offsets = [0, 64], sizes = [2, 32], strides = [1, 1]} : vector<2x128xf32> to vector<2x32xf32>
    %318 = vector.extract_strided_slice %314 {offsets = [0, 96], sizes = [2, 32], strides = [1, 1]} : vector<2x128xf32> to vector<2x32xf32>
    %319 = arith.mulf %316, %302 : vector<2x32xf32>
    %320 = arith.mulf %315, %317 : vector<2x32xf32>
    %321 = arith.addf %319, %320 : vector<2x32xf32>
    %322 = math.tanh %321 : vector<2x32xf32>
    %323 = arith.mulf %318, %322 : vector<2x32xf32>
    %324 = vector.extract_strided_slice %206 {offsets = [12, 0], sizes = [2, 128], strides = [1, 1]} : vector<16x128xf32> to vector<2x128xf32>
    %cst_66 = arith.constant dense<0.000000e+00> : vector<2x128xf32>
    %325 = tpu.matmul %323, %207, %cst_66 {dimension_numbers = #tpu.dot_dimension_numbers<[1], [0], [0], [1], [0, 0, 1, 1], [], []>} : vector<2x32xf32>, vector<32x128xf32>, vector<2x128xf32> -> vector<2x128xf32>
    %326 = arith.addf %324, %325 : vector<2x128xf32>
    %327 = math.tanh %326 : vector<2x128xf32>
    %328 = arith.negf %326 : vector<2x128xf32>
    %329 = math.exp %328 : vector<2x128xf32>
    %cst_67 = arith.constant 1.000000e+00 : f32
    %330 = vector.broadcast %cst_67 : f32 to vector<2x128xf32>
    %331 = arith.addf %330, %329 : vector<2x128xf32>
    %332 = arith.divf %330, %331 : vector<2x128xf32>
    %333 = arith.select %5, %327, %332 : vector<2x128xi1>, vector<2x128xf32>
    %334 = vector.extract_strided_slice %333 {offsets = [0, 0], sizes = [2, 32], strides = [1, 1]} : vector<2x128xf32> to vector<2x32xf32>
    %335 = vector.extract_strided_slice %333 {offsets = [0, 32], sizes = [2, 32], strides = [1, 1]} : vector<2x128xf32> to vector<2x32xf32>
    %336 = vector.extract_strided_slice %333 {offsets = [0, 64], sizes = [2, 32], strides = [1, 1]} : vector<2x128xf32> to vector<2x32xf32>
    %337 = vector.extract_strided_slice %333 {offsets = [0, 96], sizes = [2, 32], strides = [1, 1]} : vector<2x128xf32> to vector<2x32xf32>
    %338 = arith.mulf %335, %321 : vector<2x32xf32>
    %339 = arith.mulf %334, %336 : vector<2x32xf32>
    %340 = arith.addf %338, %339 : vector<2x32xf32>
    %341 = math.tanh %340 : vector<2x32xf32>
    %342 = arith.mulf %337, %341 : vector<2x32xf32>
    %343 = vector.extract_strided_slice %206 {offsets = [14, 0], sizes = [2, 128], strides = [1, 1]} : vector<16x128xf32> to vector<2x128xf32>
    %cst_68 = arith.constant dense<0.000000e+00> : vector<2x128xf32>
    %344 = tpu.matmul %342, %207, %cst_68 {dimension_numbers = #tpu.dot_dimension_numbers<[1], [0], [0], [1], [0, 0, 1, 1], [], []>} : vector<2x32xf32>, vector<32x128xf32>, vector<2x128xf32> -> vector<2x128xf32>
    %345 = arith.addf %343, %344 : vector<2x128xf32>
    %346 = math.tanh %345 : vector<2x128xf32>
    %347 = arith.negf %345 : vector<2x128xf32>
    %348 = math.exp %347 : vector<2x128xf32>
    %cst_69 = arith.constant 1.000000e+00 : f32
    %349 = vector.broadcast %cst_69 : f32 to vector<2x128xf32>
    %350 = arith.addf %349, %348 : vector<2x128xf32>
    %351 = arith.divf %349, %350 : vector<2x128xf32>
    %352 = arith.select %5, %346, %351 : vector<2x128xi1>, vector<2x128xf32>
    %353 = vector.extract_strided_slice %352 {offsets = [0, 0], sizes = [2, 32], strides = [1, 1]} : vector<2x128xf32> to vector<2x32xf32>
    %354 = vector.extract_strided_slice %352 {offsets = [0, 32], sizes = [2, 32], strides = [1, 1]} : vector<2x128xf32> to vector<2x32xf32>
    %355 = vector.extract_strided_slice %352 {offsets = [0, 64], sizes = [2, 32], strides = [1, 1]} : vector<2x128xf32> to vector<2x32xf32>
    %356 = vector.extract_strided_slice %352 {offsets = [0, 96], sizes = [2, 32], strides = [1, 1]} : vector<2x128xf32> to vector<2x32xf32>
    %357 = arith.mulf %354, %340 : vector<2x32xf32>
    %358 = arith.mulf %353, %355 : vector<2x32xf32>
    %359 = arith.addf %357, %358 : vector<2x32xf32>
    %360 = math.tanh %359 : vector<2x32xf32>
    %361 = arith.mulf %356, %360 : vector<2x32xf32>
    %cst_70 = arith.constant 0.000000e+00 : f32
    %362 = vector.broadcast %cst_70 : f32 to vector<4x32xf32>
    %c16 = arith.constant 16 : index
    %c0_71 = arith.constant 0 : index
    %363 = vector.load %arg16[%c16, %c0_71] : memref<20x32xf32, #tpu.memory_space<vmem>>, vector<4x32xf32>
    tpu.vector_store %arg16[%c16, %c0_71], %362 {strides = array<i32>} : memref<20x32xf32, #tpu.memory_space<vmem>>, vector<4x32xf32>,
    %c0_72 = arith.constant 0 : index
    %c0_73 = arith.constant 0 : index
    %364 = vector.load %arg16[%c0_72, %c0_73] : memref<20x32xf32, #tpu.memory_space<vmem>>, vector<2x32xf32>
    tpu.vector_store %arg16[%c0_72, %c0_73], %228 {strides = array<i32>} : memref<20x32xf32, #tpu.memory_space<vmem>>, vector<2x32xf32>,
    %c2_74 = arith.constant 2 : index
    %c0_75 = arith.constant 0 : index
    %365 = vector.load %arg16[%c2_74, %c0_75] : memref<20x32xf32, #tpu.memory_space<vmem>>, vector<2x32xf32>
    tpu.vector_store %arg16[%c2_74, %c0_75], %247 {strides = array<i32>} : memref<20x32xf32, #tpu.memory_space<vmem>>, vector<2x32xf32>,
    %c4_76 = arith.constant 4 : index
    %c0_77 = arith.constant 0 : index
    %366 = vector.load %arg16[%c4_76, %c0_77] : memref<20x32xf32, #tpu.memory_space<vmem>>, vector<2x32xf32>
    tpu.vector_store %arg16[%c4_76, %c0_77], %266 {strides = array<i32>} : memref<20x32xf32, #tpu.memory_space<vmem>>, vector<2x32xf32>,
    %c6_78 = arith.constant 6 : index
    %c0_79 = arith.constant 0 : index
    %367 = vector.load %arg16[%c6_78, %c0_79] : memref<20x32xf32, #tpu.memory_space<vmem>>, vector<2x32xf32>
    tpu.vector_store %arg16[%c6_78, %c0_79], %285 {strides = array<i32>} : memref<20x32xf32, #tpu.memory_space<vmem>>, vector<2x32xf32>,
    %c8_80 = arith.constant 8 : index
    %c0_81 = arith.constant 0 : index
    %368 = vector.load %arg16[%c8_80, %c0_81] : memref<20x32xf32, #tpu.memory_space<vmem>>, vector<2x32xf32>
    tpu.vector_store %arg16[%c8_80, %c0_81], %304 {strides = array<i32>} : memref<20x32xf32, #tpu.memory_space<vmem>>, vector<2x32xf32>,
    %c10_82 = arith.constant 10 : index
    %c0_83 = arith.constant 0 : index
    %369 = vector.load %arg16[%c10_82, %c0_83] : memref<20x32xf32, #tpu.memory_space<vmem>>, vector<2x32xf32>
    tpu.vector_store %arg16[%c10_82, %c0_83], %323 {strides = array<i32>} : memref<20x32xf32, #tpu.memory_space<vmem>>, vector<2x32xf32>,
    %c12_84 = arith.constant 12 : index
    %c0_85 = arith.constant 0 : index
    %370 = vector.load %arg16[%c12_84, %c0_85] : memref<20x32xf32, #tpu.memory_space<vmem>>, vector<2x32xf32>
    tpu.vector_store %arg16[%c12_84, %c0_85], %342 {strides = array<i32>} : memref<20x32xf32, #tpu.memory_space<vmem>>, vector<2x32xf32>,
    %c14_86 = arith.constant 14 : index
    %c0_87 = arith.constant 0 : index
    %371 = vector.load %arg16[%c14_86, %c0_87] : memref<20x32xf32, #tpu.memory_space<vmem>>, vector<2x32xf32>
    tpu.vector_store %arg16[%c14_86, %c0_87], %361 {strides = array<i32>} : memref<20x32xf32, #tpu.memory_space<vmem>>, vector<2x32xf32>,
    %c0_88 = arith.constant 0 : index
    %c0_89 = arith.constant 0 : index
    %372 = vector.load %arg16[%c0_88, %c0_89] : memref<20x32xf32, #tpu.memory_space<vmem>>, vector<20x32xf32>
    %c0_90 = arith.constant 0 : index
    %c0_91 = arith.constant 0 : index
    %373 = vector.load %arg9[%c0_90, %c0_91] : memref<3x32xf32, #tpu.memory_space<vmem>>, vector<1x32xf32>
    %374 = vector.extract_strided_slice %372 {offsets = [0, 0], sizes = [16, 32], strides = [1, 1]} : vector<20x32xf32> to vector<16x32xf32>
    %375 = vector.broadcast %373 : vector<1x32xf32> to vector<16x32xf32>
    %376 = arith.mulf %375, %374 : vector<16x32xf32>
    %c1 = arith.constant 1 : index
    %c0_92 = arith.constant 0 : index
    %377 = vector.load %arg9[%c1, %c0_92] : memref<3x32xf32, #tpu.memory_space<vmem>>, vector<1x32xf32>
    %378 = vector.extract_strided_slice %372 {offsets = [2, 0], sizes = [16, 32], strides = [1, 1]} : vector<20x32xf32> to vector<16x32xf32>
    %379 = vector.broadcast %377 : vector<1x32xf32> to vector<16x32xf32>
    %380 = arith.mulf %379, %378 : vector<16x32xf32>
    %381 = arith.addf %376, %380 : vector<16x32xf32>
    %c2_93 = arith.constant 2 : index
    %c0_94 = arith.constant 0 : index
    %382 = vector.load %arg9[%c2_93, %c0_94] : memref<3x32xf32, #tpu.memory_space<vmem>>, vector<1x32xf32>
    %383 = vector.extract_strided_slice %372 {offsets = [4, 0], sizes = [16, 32], strides = [1, 1]} : vector<20x32xf32> to vector<16x32xf32>
    %384 = vector.broadcast %382 : vector<1x32xf32> to vector<16x32xf32>
    %385 = arith.mulf %384, %383 : vector<16x32xf32>
    %386 = arith.addf %381, %385 : vector<16x32xf32>
    %cst_95 = arith.constant 0.000000e+00 : f32
    %cst_96 = arith.constant 2.000000e+01 : f32
    %387 = vector.broadcast %cst_95 : f32 to vector<16x32xf32>
    %388 = arith.maximumf %387, %386 : vector<16x32xf32>
    %389 = vector.broadcast %cst_96 : f32 to vector<16x32xf32>
    %390 = arith.minimumf %389, %388 : vector<16x32xf32>
    %c0_97 = arith.constant 0 : index
    %c0_98 = arith.constant 0 : index
    %391 = vector.load %arg10[%c0_97, %c0_98] : memref<1x32xf32, #tpu.memory_space<vmem>>, vector<1x32xf32>
    %c0_99 = arith.constant 0 : index
    %c0_100 = arith.constant 0 : index
    %392 = vector.load %arg11[%c0_99, %c0_100] : memref<1x32xf32, #tpu.memory_space<vmem>>, vector<1x32xf32>
    %cst_101 = arith.constant dense<0.000000e+00> : vector<32xf32>
    %393 = vector.multi_reduction <add>, %390, %cst_101 [0] : vector<16x32xf32> to vector<32xf32>
    %394 = vector.shape_cast %393 : vector<32xf32> to vector<1x32xf32>
    %cst_102 = arith.constant 1.600000e+01 : f32
    %395 = vector.broadcast %cst_102 : f32 to vector<1x32xf32>
    %396 = arith.divf %394, %395 : vector<1x32xf32>
    %397 = vector.broadcast %396 : vector<1x32xf32> to vector<16x32xf32>
    %398 = arith.subf %390, %397 : vector<16x32xf32>
    %399 = vector.broadcast %396 : vector<1x32xf32> to vector<16x32xf32>
    %400 = arith.subf %390, %399 : vector<16x32xf32>
    %401 = arith.mulf %398, %400 : vector<16x32xf32>
    %cst_103 = arith.constant dense<0.000000e+00> : vector<32xf32>
    %402 = vector.multi_reduction <add>, %401, %cst_103 [0] : vector<16x32xf32> to vector<32xf32>
    %403 = vector.shape_cast %402 : vector<32xf32> to vector<1x32xf32>
    %cst_104 = arith.constant 1.600000e+01 : f32
    %404 = vector.broadcast %cst_104 : f32 to vector<1x32xf32>
    %405 = arith.divf %403, %404 : vector<1x32xf32>
    %406 = vector.broadcast %396 : vector<1x32xf32> to vector<16x32xf32>
    %407 = arith.subf %390, %406 : vector<16x32xf32>
    %cst_105 = arith.constant 9.99999974E-6 : f32
    %408 = vector.broadcast %cst_105 : f32 to vector<1x32xf32>
    %409 = arith.addf %405, %408 : vector<1x32xf32>
    %410 = math.rsqrt %409 : vector<1x32xf32>
    %411 = vector.broadcast %410 : vector<1x32xf32> to vector<16x32xf32>
    %412 = arith.mulf %407, %411 : vector<16x32xf32>
    %413 = vector.broadcast %391 : vector<1x32xf32> to vector<16x32xf32>
    %414 = arith.mulf %412, %413 : vector<16x32xf32>
    %415 = vector.broadcast %392 : vector<1x32xf32> to vector<16x32xf32>
    %416 = arith.addf %414, %415 : vector<16x32xf32>
    %c0_106 = arith.constant 0 : index
    %c0_107 = arith.constant 0 : index
    %417 = vector.load %arg12[%c0_106, %c0_107] : memref<32x16xf32, #tpu.memory_space<vmem>>, vector<32x16xf32>
    %cst_108 = arith.constant dense<0.000000e+00> : vector<16x16xf32>
    %418 = tpu.matmul %416, %417, %cst_108 {dimension_numbers = #tpu.dot_dimension_numbers<[1], [0], [0], [1], [0, 0, 1, 1], [], []>} : vector<16x32xf32>, vector<32x16xf32>, vector<16x16xf32> -> vector<16x16xf32>
    %cst_109 = arith.constant dense<0xFF800000> : vector<16xf32>
    %419 = vector.multi_reduction <maximumf>, %418, %cst_109 [1] : vector<16x16xf32> to vector<16xf32>
    %420 = vector.shape_cast %419 : vector<16xf32> to vector<16x1xf32>
    %421 = vector.broadcast %420 : vector<16x1xf32> to vector<16x16xf32>
    %422 = arith.subf %418, %421 : vector<16x16xf32>
    %423 = math.exp %422 : vector<16x16xf32>
    %cst_110 = arith.constant dense<0.000000e+00> : vector<16xf32>
    %424 = vector.multi_reduction <add>, %423, %cst_110 [1] : vector<16x16xf32> to vector<16xf32>
    %425 = vector.shape_cast %424 : vector<16xf32> to vector<16x1xf32>
    %426 = vector.broadcast %425 : vector<16x1xf32> to vector<16x16xf32>
    %427 = arith.divf %423, %426 : vector<16x16xf32>
    %c0_111 = arith.constant 0 : index
    %c0_112 = arith.constant 0 : index
    %428 = vector.load %arg14[%c0_111, %c0_112] : memref<16x16xf32, #tpu.memory_space<vmem>>, vector<16x16xf32>
    tpu.vector_store %arg14[%c0_111, %c0_112], %427 {strides = array<i32>} : memref<16x16xf32, #tpu.memory_space<vmem>>, vector<16x16xf32>,
    %429 = vector.broadcast %420 : vector<16x1xf32> to vector<16x16xf32>
    %430 = arith.subf %418, %429 : vector<16x16xf32>
    %431 = math.log %425 : vector<16x1xf32>
    %432 = vector.broadcast %431 : vector<16x1xf32> to vector<16x16xf32>
    %433 = arith.subf %430, %432 : vector<16x16xf32>
    %c0_113 = arith.constant 0 : index
    %c0_114 = arith.constant 0 : index
    %434 = vector.load %arg13[%c0_113, %c0_114] : memref<16x16xf32, #tpu.memory_space<vmem>>, vector<16x16xf32>
    tpu.vector_store %arg13[%c0_113, %c0_114], %433 {strides = array<i32>} : memref<16x16xf32, #tpu.memory_space<vmem>>, vector<16x16xf32>,
    return
  }
}

</mosaic_0001>

<bundles_post_ra>
// kernel: model_forward.1
= control target key start
LH: loop header
LB: loop body
LE: loop exit
PB: predicated region body
PF: predicated region fallthrough
CT: control target
= control target key end

     0   :  { %20 = vsyncpa [#allocation5], 0  ;;  %s3604_s0 = inlined_call_operand.vmem [shape: f32[16,32], index: 0, kind: input, shape index: {}]   ;;  %s3605_s1 = inlined_call_operand.vmem [shape: f32[32,128], index: 1, kind: input, shape index: {}]   ;;  %s3606_s2 = inlined_call_operand.vmem [shape: f32[32,128], index: 2, kind: input, shape index: {}]   ;;  %s3607_s3 = inlined_call_operand.vmem [shape: f32[1,128], index: 3, kind: input, shape index: {}]   ;;  %s3608_s4 = inlined_call_operand.vmem [shape: f32[1,32], index: 4, kind: input, shape index: {}]   ;;  %s3609_s5 = inlined_call_operand.hbm [shape: f32[1,32], index: 5, kind: input, shape index: {}]   ;;  %s3610_s6 = inlined_call_operand.vmem [shape: f32[32,128], index: 6, kind: input, shape index: {}]   ;;  %s3611_s7 = inlined_call_operand.vmem [shape: f32[32,128], index: 7, kind: input, shape index: {}]   ;;  %s3612_s8 = inlined_call_operand.vmem [shape: f32[1,128], index: 8, kind: input, shape index: {}]   ;;  %s3613_s9 = inlined_call_operand.vmem [shape: f32[3,32], index: 9, kind: input, shape index: {}]   ;;  %s3614_s10 = inlined_call_operand.hbm [shape: f32[1,32], index: 10, kind: input, shape index: {}]   ;;  %s3615_s11 = inlined_call_operand.hbm [shape: f32[1,32], index: 11, kind: input, shape index: {}]   ;;  %s3616_s12 = inlined_call_operand.vmem [shape: f32[32,16], index: 12, kind: input, shape index: {}]   ;;  %s3617_s13 = inlined_call_operand.hbm [shape: f32[16,16], index: 13, kind: output, shape index: {0}]   ;;  %s3618_s14 = inlined_call_operand.vmem [shape: f32[16,16], index: 14, kind: output, shape index: {1}]  }
   0x1   :  { %21 = vsyncpa [#allocation8], 0 }
   0x2   :  { %22 = vsyncpa [#allocation6], 0  ;;  %s3055_s29 = smov [#allocation7]   ;;  %s3056_s15 = smov [#allocation4]  }
   0x3   :  { %s57_s30 = sshll.u32 %s3055_s29, 4  ;;  %s39_s16 = sshll.u32 %s3056_s15, 4  ;;  %s58_s30 = int_to_ptr.vmem [resolvable:$true] %s57_s30  ;;  %s40_s16 = int_to_ptr.vmem [resolvable:$true] %s39_s16 }
   0x4   :  { %s2961_s19 = scalar_lea.hbm %s3614_s10, 16 }
   0x5   :  { %p2962_p0 = scmp.ne.s32.totalorder %s3614_s10, %s2961_s19  ;;  %p2965_p1 = scmp.lt.u32.totalorder %s2961_s19, %s3614_s10 }
   0x7   :  { %p2967_p2 = pnand %p2965_p1, %p2962_p0 }
   0x9   :  { %2970 = shalt.err (!%p2967_p2)
}
   0xa   :  { %s2971_s24 = scalar_lea.vmem %s58_s30, 16  ;;  %s2975_s25 = scalar_lea.vmem %s58_s30, 32 }
   0xb   :  { %p2972_p3 = scmp.ne.s32.totalorder %s58_s30, %s2971_s24  ;;  %p2976_p4 = scmp.lt.s32.totalorder %s58_s30, %s58_s30 }
   0xc   :  { %p2977_p5 = scmp.lt.s32.totalorder %s2975_s25, %s2971_s24 }
   0xe   :  { %p2978_p6 = por %p2977_p5, %p2976_p4 }
  0x10   :  { %p2979_p7 = pnand %p2978_p6, %p2972_p3 }
  0x12   :  { %2982 = shalt.err (!%p2979_p7)
}
  0x13   :  { %60 = dma.hbm_to_vmem [thread:$0]  %s3614_s10, 16, %s58_s30, [#allocation8]  }
  0x14   :  { %s2983_s15 = scalar_lea.hbm %s3609_s5, 16 }
  0x15   :  { %p2984_p8 = scmp.ne.s32.totalorder %s3609_s5, %s2983_s15  ;;  %p2987_p9 = scmp.lt.u32.totalorder %s2983_s15, %s3609_s5 }
  0x17   :  { %p2989_p10 = pnand %p2987_p9, %p2984_p8 }
  0x19   :  { %2992 = shalt.err (!%p2989_p10)
}
  0x1a   :  { %s2993_s21 = scalar_lea.vmem %s40_s16, 16  ;;  %s2997_s22 = scalar_lea.vmem %s40_s16, 32 }
  0x1b   :  { %p2994_p11 = scmp.ne.s32.totalorder %s40_s16, %s2993_s21  ;;  %p2998_p12 = scmp.lt.s32.totalorder %s40_s16, %s40_s16 }
  0x1c   :  { %p2999_p13 = scmp.lt.s32.totalorder %s2997_s22, %s2993_s21 }
  0x1e   :  { %p3000_p0 = por %p2999_p13, %p2998_p12 }
  0x20   :  { %p3001_p1 = pnand %p3000_p0, %p2994_p11 }
  0x22   :  { %3004 = shalt.err (!%p3001_p1)
}
  0x23   :  { %42 = dma.hbm_to_vmem [thread:$0]  %s3609_s5, 16, %s40_s16, [#allocation5]  }
  0x24   :  { %s3057_s23 = smov [#allocation9]   ;;  %s3005_s27 = scalar_lea.hbm %s3615_s11, 16 }
  0x25   :  { %s67_s24 = sshll.u32 %s3057_s23, 4  ;;  %p3006_p2 = scmp.ne.s32.totalorder %s3615_s11, %s3005_s27  ;;  %s68_s24 = int_to_ptr.vmem [resolvable:$true] %s67_s24 }
  0x26   :  { %p3009_p3 = scmp.lt.u32.totalorder %s3005_s27, %s3615_s11 }
  0x28   :  { %p3011_p4 = pnand %p3009_p3, %p3006_p2 }
  0x2a   :  { %3014 = shalt.err (!%p3011_p4)
}
  0x2b   :  { %s3015_s18 = scalar_lea.vmem %s68_s24, 16  ;;  %s3019_s5 = scalar_lea.vmem %s68_s24, 32 }
  0x2c   :  { %p3016_p5 = scmp.ne.s32.totalorder %s68_s24, %s3015_s18  ;;  %p3020_p6 = scmp.lt.s32.totalorder %s68_s24, %s68_s24 }
  0x2d   :  { %p3021_p7 = scmp.lt.s32.totalorder %s3019_s5, %s3015_s18 }
  0x2f   :  { %p3022_p8 = por %p3021_p7, %p3020_p6 }
  0x31   :  { %p3023_p9 = pnand %p3022_p8, %p3016_p5 }
  0x33   :  { %3026 = shalt.err (!%p3023_p9)
}
  0x34   :  { %70 = dma.hbm_to_vmem [thread:$0]  %s3615_s11, 16, %s68_s24, [#allocation8]  }
  0x35   :  { %3049 = dma.done.wait [#allocation5], 16  }
  0x36   :  { %3050 = vsyncadd [#allocation5], 4294967280 }
  0x37   :  { %3051 = dma.done.wait [#allocation8], 32  }
  0x38   :  { %3052 = vsyncadd [#allocation8], 4294967264  ;;  %v3058_v0 = vmov 0.0|0.0   ;;  %vm3059_vm0 = vmmov 0   ;;  %v3060_v1 = vmov 0.0   ;;  %v89_v2 = vld [vmem:[%s3605_s1] sm:$0xff]  ;;  %v82_v26 = vlaneseq }
  0x39   :  { %2694 = vmatprep.subr.bf16.mxu1 %v3058_v0  ;;  %2496 = vmatprep.mubr.msk.f32.mxu1 %vm3059_vm0, %v3060_v1  ;;  %v90_v3 = vld [vmem:[%s3605_s1 + $0x8] sm:$0xff]  ;;  %v182_v4 = vld [vmem:[%s3606_s2] sm:$0xff]  ;;  %vm100_vm1 = vcmask 261120   ;;  %v91_v7 = vld [vmem:[%s3605_s1 + $0x10] sm:$0xff]  ;;  %s3062_s20 = smov 32   ;;  %vm1037_vm5 = vcmask 254976  }
  0x3a   :  { %v2686_v5 = vpack.c.bf16 %v90_v3, %v89_v2  ;;  %v183_v6 = vld [vmem:[%s3606_s2 + $0x8] sm:$0xff]  ;;  %v92_v8 = vld [vmem:[%s3605_s1 + $0x18] sm:$0xff]  ;;  %v87_v11 = vld [vmem:[%s3604_s0] sm:$0xff]  ;;  %v83_v28 = vand.u32 127, %v82_v26  ;;  %vm1042_vm6 = vcmask 257026   ;;  %vm1052_vm7 = vcmask 261126  }
  0x3b   :  { %v3198_v9 = vpack.c.bf16 %v183_v6, %v182_v4  ;;  %v2690_v10 = vpack.c.bf16 %v92_v8, %v91_v7  ;;  %v184_v12 = vld [vmem:[%s3606_s2 + $0x10] sm:$0xff]  ;;  %v185_v13 = vld [vmem:[%s3606_s2 + $0x18] sm:$0xff]  ;;  %2485 = vmatprep.mubr.msk.f32.mxu0 %vm100_vm1, %v87_v11  ;;  %v88_v15 = vld [vmem:[%s3604_s0 + $0x8] sm:$0xff]  ;;  %vm1047_vm8 = vcmask 259076   ;;  %vm2061_vm9 = vcmask 257024   ;;  %s3063_s25 = smov [#allocation10]  }
  0x3c   :  { %2687 = vmatprep.subr.bf16.mxu0 %v2686_v5  ;;  %v3211_v14 = vpack.c.bf16 %v185_v13, %v184_v12  ;;  %v2334_v16 = vld [vmem:[%s3607_s3] ss:$0 sm:$0xff]  ;;  %vm84_vm2 = vcmp.ge.s32.totalorder %v83_v28, 64  ;;  %vm85_vm3 = vcmp.lt.s32.totalorder %v83_v28, 96  ;;  %s3061_s3 = smov 64   ;;  %vm2113_vm10 = vcmask 1045504  }
  0x3d   :  { %2689 = vmatpush3.bf16.msra.mxu0 %v2686_v5  ;;  %2696 = vmatpush3.bf16.msra.mxu1 %v3198_v9  ;;  %vm3242_vm4 = vmand %vm84_vm2, %vm85_vm3  ;;  %2062 = vst.msk [vmem:[#allocation3 + $0x10] sm:$0xf] %vm2061_vm9, %v3060_v1  ;;  %vm2134_vm11 = vcmask 1043456   ;;  %vm2279_vm12 = vcmask 130048   ;;  %s2317_s26 = sshll.u32 %s3063_s25, 4  ;;  %s2318_s26 = int_to_ptr.vmem [resolvable:$true] %s2317_s26 }
  0x3e   :  { %2691 = vmatprep.subr.bf16.mxu0 %v2690_v10  ;;  %2697 = vmatprep.subr.bf16.mxu1 %v3058_v0  ;;  %s3027_s29 = scalar_lea.vmem %s2318_s26, 256  ;;  %p3032_p11 = scmp.lt.s32.totalorder %s2318_s26, %s2318_s26 }
  0x3f   :  { %p3028_p10 = scmp.ne.s32.totalorder %s2318_s26, %s3027_s29  ;;  %p3033_p12 = scmp.lt.s32.totalorder %s3027_s29, %s3027_s29 }
  0x41   :  { %2693 = vmatpush3.bf16.msra.mxu0 %v2690_v10  ;;  %2699 = vmatpush3.bf16.msra.mxu1 %v3211_v14  ;;  %p3034_p13 = por %p3033_p12, %p3032_p11 }
  0x42   :  { %2700 = vmatprep.subr.bf16.mxu0 %v3058_v0  ;;  %2706 = vmatprep.subr.bf16.mxu1 %v3058_v0 }
  0x43   :  { %p3035_p0 = pnand %p3034_p13, %p3028_p10 }
  0x44   :  { %2486 = vmatmul.mubr.msk.f32.vlgmr.msra.gmra.mrb[0].mxu0 %vm100_vm1, %v88_v15  ;;  %2497 = vmatmul.mubr.f32.vlgmr.msra.gmra.mrb[0].mxu1 %v3060_v1 }
  0x45   :  { %2702 = vmatpush3.bf16.msra.mxu0 %v3198_v9  ;;  %2507 = vmatprep.mubr.msk.f32.mxu0 %vm3059_vm0, %v3060_v1 }
  0x46   :  { %2703 = vmatprep.subr.bf16.mxu0 %v3058_v0  ;;  %2708 = vmatpush3.bf16.msra.mxu1 %v3198_v9 }
  0x47   :  { %2709 = vmatprep.subr.bf16.mxu1 %v3058_v0  ;;  %2518 = vmatprep.mubr.msk.f32.mxu1 %vm3059_vm0, %v3060_v1 }
  0x49   :  { %2705 = vmatpush3.bf16.msra.mxu0 %v3211_v14 }
  0x4a   :  { %2711 = vmatpush3.bf16.msra.mxu1 %v3211_v14  ;;  %2712 = vmatprep.subr.bf16.mxu0 %v3058_v0 }
  0x4b   :  { %2718 = vmatprep.subr.bf16.mxu1 %v3058_v0 }
 0x117   :  { %v2487_v17 = vpop.f32.mrb[0].mxu0  ;;  %v255_v18 = vpop.f32.mrb[0].mxu1 }
 0x118   :  { %v3237_v19 = vadd.f32 %v2487_v17, %v2334_v16  ;;  %v173_v20 = vpop.f32.mrb[1].mxu0  ;;  %v2498_v21 = vpop.f32.mrb[1].mxu1 }
 0x119   :  { %v3239_v22 = vadd.f32 %v2334_v16, %v173_v20 }
 0x11b   :  { %v259_v23 = vadd.f32 %v255_v18, %v3239_v22 }
 0x11d   :  { %v2337_v24 = vmul.f32 -1.442695, %v259_v23 }
 0x11f   :  { %2817 = vpow2.f32 %v2337_v24 }
 0x120   :  { %2819 = vtanh.f32 %v259_v23 }
 0x129   :  { %v2818_v25 = vpop.eup %2817 }
 0x12a   :  { %v264_v27 = vadd.f32 1.0, %v2818_v25  ;;  %v2820_v30 = vpop.eup %2819 }
 0x12c   :  { %2821 = vrcp.f32 %v264_v27 }
 0x136   :  { %v2822_v31 = vpop.eup %2821 }
 0x137   :  { %v267_v32 = vsel %vm3242_vm4, %v2820_v30, %v2822_v31 }
 0x138   :  { %270 = vrot.lane.b32.xlu0 %v267_v32, %s3061_s3  ;;  %v268_v35 = vmul.f32 0.0, %v267_v32 }
 0x1aa   :  { %v271_v33 = vpop.permute.xlu0 %270 }
 0x1ab   :  { %v273_v34 = vmul.f32 %v271_v33, %v267_v32 }
 0x1ad   :  { %275 = vrot.lane.b32.xlu0 %v273_v34, %s3062_s20 }
 0x21f   :  { %v276_v36 = vpop.permute.xlu0 %275 }
 0x220   :  { %v278_v37 = vadd.f32 %v276_v36, %v268_v35 }
 0x222   :  { %2823 = vtanh.f32 %v278_v37  ;;  %v373_v54 = vrot.slane %v278_v37, 6 }
 0x22c   :  { %v2824_v38 = vpop.eup %2823 }
 0x22d   :  { %281 = vrot.lane.b32.xlu1 %v2824_v38, %s3061_s3 }
 0x29f   :  { %v282_v39 = vpop.permute.xlu1 %281 }
 0x2a0   :  { %v284_v40 = vmul.f32 %v282_v39, %v267_v32 }
 0x2a2   :  { %286 = vrot.lane.b32.xlu1 %v284_v40, %s3062_s20 }
 0x314   :  { %v287_v41 = vpop.permute.xlu1 %286 }
 0x315   :  { %1038 = vst.msk [vmem:[#allocation2] sm:$0x3] %vm1037_vm5, %v287_v41  ;;  %2508 = vmatmul.mubr.msk.f32.vlgmr.msra.gmra.mrb[2].mxu0 %vm100_vm1, %v287_v41 }
 0x316   :  { %2714 = vmatpush3.bf16.msra.mxu0 %v3198_v9  ;;  %2529 = vmatprep.mubr.msk.f32.mxu0 %vm3059_vm0, %v3060_v1 }
 0x317   :  { %2715 = vmatprep.subr.bf16.mxu0 %v3058_v0 }
 0x31a   :  { %2717 = vmatpush3.bf16.msra.mxu0 %v3211_v14 }
 0x31b   :  { %2724 = vmatprep.subr.bf16.mxu0 %v3058_v0 }
 0x3e8   :  { %v356_v42 = vpop.f32.mrb[2].mxu0 }
 0x3e9   :  { %v361_v43 = vrot.slane %v356_v42, 6  ;;  %v2509_v44 = vpop.f32.mrb[3].mxu0 }
 0x3eb   :  { %v363_v45 = vadd.f32 %v361_v43, %v3239_v22 }
 0x3ed   :  { %v2339_v46 = vmul.f32 -1.442695, %v363_v45 }
 0x3ef   :  { %2825 = vpow2.f32 %v2339_v46 }
 0x3f0   :  { %2827 = vtanh.f32 %v363_v45 }
 0x3f9   :  { %v2826_v47 = vpop.eup %2825 }
 0x3fa   :  { %v368_v48 = vadd.f32 1.0, %v2826_v47  ;;  %v2828_v49 = vpop.eup %2827 }
 0x3fc   :  { %2829 = vrcp.f32 %v368_v48 }
 0x406   :  { %v2830_v50 = vpop.eup %2829 }
 0x407   :  { %v371_v51 = vsel %vm3242_vm4, %v2828_v49, %v2830_v50 }
 0x408   :  { %377 = vrot.lane.b32.xlu0 %v371_v51, %s3061_s3  ;;  %v375_v55 = vmul.f32 %v373_v54, %v371_v51 }
 0x47a   :  { %v378_v52 = vpop.permute.xlu0 %377 }
 0x47b   :  { %v380_v53 = vmul.f32 %v378_v52, %v371_v51 }
 0x47d   :  { %382 = vrot.lane.b32.xlu1 %v380_v53, %s3062_s20 }
 0x4ef   :  { %v383_v56 = vpop.permute.xlu1 %382 }
 0x4f0   :  { %v385_v57 = vadd.f32 %v383_v56, %v375_v55 }
 0x4f2   :  { %2831 = vtanh.f32 %v385_v57  ;;  %v481_v15 = vrot.slane %v385_v57, 6 }
 0x4fc   :  { %v2832_v58 = vpop.eup %2831 }
 0x4fd   :  { %388 = vrot.lane.b32.xlu0 %v2832_v58, %s3061_s3 }
 0x56f   :  { %v389_v59 = vpop.permute.xlu0 %388 }
 0x570   :  { %v3266_v60 = vmul.f32 %v389_v59, %v371_v51 }
 0x572   :  { %v393_v61 = vrot.slane %v3266_v60, 2 }
 0x574   :  { %394 = vrot.lane.b32.xlu1 %v393_v61, %s3062_s20 }
 0x5e6   :  { %v395_v62 = vpop.permute.xlu1 %394 }
 0x5e7   :  { %2519 = vmatmul.mubr.msk.f32.vlgmr.msra.gmra.mrb[2].mxu1 %vm100_vm1, %v395_v62 }
 0x5e8   :  { %2720 = vmatpush3.bf16.msra.mxu1 %v3198_v9  ;;  %2540 = vmatprep.mubr.msk.f32.mxu1 %vm3059_vm0, %v3060_v1 }
 0x5e9   :  { %2721 = vmatprep.subr.bf16.mxu1 %v3058_v0 }
 0x5ec   :  { %2723 = vmatpush3.bf16.msra.mxu1 %v3211_v14 }
 0x5ed   :  { %2730 = vmatprep.subr.bf16.mxu1 %v3058_v0 }
 0x6ba   :  { %v464_v63 = vpop.f32.mrb[2].mxu1 }
 0x6bb   :  { %v469_v2 = vrot.slane %v464_v63, 4  ;;  %v2520_v3 = vpop.f32.mrb[3].mxu1 }
 0x6bd   :  { %v471_v4 = vadd.f32 %v469_v2, %v3239_v22 }
 0x6bf   :  { %v2341_v5 = vmul.f32 -1.442695, %v471_v4 }
 0x6c1   :  { %2833 = vpow2.f32 %v2341_v5 }
 0x6c2   :  { %2835 = vtanh.f32 %v471_v4 }
 0x6cb   :  { %v2834_v6 = vpop.eup %2833 }
 0x6cc   :  { %v476_v7 = vadd.f32 1.0, %v2834_v6  ;;  %v2836_v8 = vpop.eup %2835 }
 0x6ce   :  { %2837 = vrcp.f32 %v476_v7 }
 0x6d8   :  { %v2838_v10 = vpop.eup %2837 }
 0x6d9   :  { %v479_v11 = vsel %vm3242_vm4, %v2836_v8, %v2838_v10 }
 0x6da   :  { %485 = vrot.lane.b32.xlu0 %v479_v11, %s3061_s3  ;;  %v483_v16 = vmul.f32 %v481_v15, %v479_v11 }
 0x74c   :  { %v486_v12 = vpop.permute.xlu0 %485 }
 0x74d   :  { %v488_v13 = vmul.f32 %v486_v12, %v479_v11 }
 0x74f   :  { %490 = vrot.lane.b32.xlu1 %v488_v13, %s3062_s20 }
 0x7c1   :  { %v491_v17 = vpop.permute.xlu1 %490 }
 0x7c2   :  { %v493_v18 = vadd.f32 %v491_v17, %v483_v16 }
 0x7c4   :  { %2839 = vtanh.f32 %v493_v18  ;;  %v589_v39 = vrot.slane %v493_v18, 6 }
 0x7ce   :  { %v2840_v20 = vpop.eup %2839 }
 0x7cf   :  { %496 = vrot.lane.b32.xlu0 %v2840_v20, %s3061_s3 }
 0x841   :  { %v497_v21 = vpop.permute.xlu0 %496 }
 0x842   :  { %v3283_v23 = vmul.f32 %v497_v21, %v479_v11 }
 0x844   :  { %v501_v24 = vrot.slane %v3283_v23, 4 }
 0x846   :  { %502 = vrot.lane.b32.xlu1 %v501_v24, %s3062_s20 }
 0x8b8   :  { %v503_v25 = vpop.permute.xlu1 %502 }
 0x8b9   :  { %2530 = vmatmul.mubr.msk.f32.vlgmr.msra.gmra.mrb[4].mxu0 %vm100_vm1, %v503_v25 }
 0x8ba   :  { %2726 = vmatpush3.bf16.msra.mxu0 %v3198_v9  ;;  %2551 = vmatprep.mubr.msk.f32.mxu0 %vm3059_vm0, %v3060_v1 }
 0x8bb   :  { %2727 = vmatprep.subr.bf16.mxu0 %v3058_v0 }
 0x8be   :  { %2729 = vmatpush3.bf16.msra.mxu0 %v3211_v14 }
 0x8bf   :  { %2736 = vmatprep.subr.bf16.mxu0 %v3058_v0 }
 0x98c   :  { %v572_v26 = vpop.f32.mrb[4].mxu0 }
 0x98d   :  { %v577_v27 = vrot.slane %v572_v26, 2  ;;  %v2531_v28 = vpop.f32.mrb[5].mxu0 }
 0x98f   :  { %v579_v30 = vadd.f32 %v577_v27, %v3239_v22 }
 0x991   :  { %v2343_v31 = vmul.f32 -1.442695, %v579_v30 }
 0x993   :  { %2841 = vpow2.f32 %v2343_v31 }
 0x994   :  { %2843 = vtanh.f32 %v579_v30 }
 0x99d   :  { %v2842_v32 = vpop.eup %2841 }
 0x99e   :  { %v584_v33 = vadd.f32 1.0, %v2842_v32  ;;  %v2844_v34 = vpop.eup %2843 }
 0x9a0   :  { %2845 = vrcp.f32 %v584_v33 }
 0x9aa   :  { %v2846_v35 = vpop.eup %2845 }
 0x9ab   :  { %v587_v36 = vsel %vm3242_vm4, %v2844_v34, %v2846_v35 }
 0x9ac   :  { %593 = vrot.lane.b32.xlu0 %v587_v36, %s3061_s3  ;;  %v591_v40 = vmul.f32 %v589_v39, %v587_v36 }
 0xa1e   :  { %v594_v37 = vpop.permute.xlu0 %593 }
 0xa1f   :  { %v596_v38 = vmul.f32 %v594_v37, %v587_v36 }
 0xa21   :  { %598 = vrot.lane.b32.xlu1 %v596_v38, %s3062_s20 }
 0xa93   :  { %v599_v22 = vpop.permute.xlu1 %598 }
 0xa94   :  { %v601_v41 = vadd.f32 %v599_v22, %v591_v40 }
 0xa96   :  { %2847 = vtanh.f32 %v601_v41  ;;  %v694_v58 = vrot.slane %v601_v41, 6 }
 0xaa0   :  { %v2848_v42 = vpop.eup %2847 }
 0xaa1   :  { %604 = vrot.lane.b32.xlu0 %v2848_v42, %s3061_s3 }
 0xb13   :  { %v605_v43 = vpop.permute.xlu0 %604 }
 0xb14   :  { %v3300_v44 = vmul.f32 %v605_v43, %v587_v36 }
 0xb16   :  { %v609_v45 = vrot.slane %v3300_v44, 6 }
 0xb18   :  { %610 = vrot.lane.b32.xlu1 %v609_v45, %s3062_s20 }
 0xb8a   :  { %v611_v46 = vpop.permute.xlu1 %610 }
 0xb8b   :  { %2541 = vmatmul.mubr.msk.f32.vlgmr.msra.gmra.mrb[4].mxu1 %vm100_vm1, %v611_v46 }
 0xb8c   :  { %2732 = vmatpush3.bf16.msra.mxu1 %v3198_v9  ;;  %2562 = vmatprep.mubr.msk.f32.mxu1 %vm3059_vm0, %v3060_v1 }
 0xb8d   :  { %2733 = vmatprep.subr.bf16.mxu1 %v3058_v0 }
 0xb90   :  { %2735 = vmatpush3.bf16.msra.mxu1 %v3211_v14 }
 0xc5e   :  { %v680_v47 = vpop.f32.mrb[4].mxu1 }
 0xc5f   :  { %v684_v48 = vadd.f32 %v680_v47, %v3237_v19  ;;  %v2542_v49 = vpop.f32.mrb[5].mxu1 }
 0xc61   :  { %v2345_v50 = vmul.f32 -1.442695, %v684_v48 }
 0xc63   :  { %2849 = vpow2.f32 %v2345_v50 }
 0xc64   :  { %2851 = vtanh.f32 %v684_v48 }
 0xc6d   :  { %v2850_v51 = vpop.eup %2849 }
 0xc6e   :  { %v689_v52 = vadd.f32 1.0, %v2850_v51  ;;  %v2852_v53 = vpop.eup %2851 }
 0xc70   :  { %2853 = vrcp.f32 %v689_v52 }
 0xc7a   :  { %v2854_v54 = vpop.eup %2853 }
 0xc7b   :  { %v692_v55 = vsel %vm3242_vm4, %v2852_v53, %v2854_v54 }
 0xc7c   :  { %698 = vrot.lane.b32.xlu0 %v692_v55, %s3061_s3  ;;  %v696_v59 = vmul.f32 %v694_v58, %v692_v55 }
 0xcee   :  { %v699_v56 = vpop.permute.xlu0 %698 }
 0xcef   :  { %v701_v57 = vmul.f32 %v699_v56, %v692_v55 }
 0xcf1   :  { %703 = vrot.lane.b32.xlu1 %v701_v57, %s3062_s20 }
 0xd63   :  { %v704_v61 = vpop.permute.xlu1 %703 }
 0xd64   :  { %v706_v62 = vadd.f32 %v704_v61, %v696_v59 }
 0xd66   :  { %2855 = vtanh.f32 %v706_v62  ;;  %v801_v17 = vrot.slane %v706_v62, 6 }
 0xd70   :  { %v2856_v63 = vpop.eup %2855 }
 0xd71   :  { %709 = vrot.lane.b32.xlu0 %v2856_v63, %s3061_s3 }
 0xde3   :  { %v710_v2 = vpop.permute.xlu0 %709 }
 0xde4   :  { %v712_v3 = vmul.f32 %v710_v2, %v692_v55 }
 0xde6   :  { %714 = vrot.lane.b32.xlu1 %v712_v3, %s3062_s20 }
 0xe58   :  { %v715_v4 = vpop.permute.xlu1 %714 }
 0xe59   :  { %1055 = vst.msk [vmem:[#allocation2 + $0x8] sm:$0x3] %vm1037_vm5, %v715_v4  ;;  %2552 = vmatmul.mubr.msk.f32.vlgmr.msra.gmra.mrb[6].mxu0 %vm100_vm1, %v715_v4 }
 0xe5a   :  { %2738 = vmatpush3.bf16.msra.mxu0 %v3198_v9  ;;  %2573 = vmatprep.mubr.msk.f32.mxu0 %vm3059_vm0, %v3060_v1 }
 0xe5b   :  { %2739 = vmatprep.subr.bf16.mxu0 %v3058_v0 }
 0xe5e   :  { %2741 = vmatpush3.bf16.msra.mxu0 %v3211_v14 }
 0xe5f   :  { %2750 = vmatprep.subr.bf16.mxu0 %v3058_v0 }
 0xf2c   :  { %v784_v5 = vpop.f32.mrb[6].mxu0 }
 0xf2d   :  { %v789_v6 = vrot.slane %v784_v5, 6  ;;  %v2553_v7 = vpop.f32.mrb[7].mxu0 }
 0xf2f   :  { %v791_v8 = vadd.f32 %v789_v6, %v3237_v19 }
 0xf31   :  { %v2347_v10 = vmul.f32 -1.442695, %v791_v8 }
 0xf33   :  { %2857 = vpow2.f32 %v2347_v10  ;;  %v1210_v10 = vld [vmem:[%s3611_s7] sm:$0xff] }
 0xf34   :  { %2859 = vtanh.f32 %v791_v8  ;;  %v1119_v8 = vld [vmem:[%s3610_s6 + $0x8] sm:$0xff] }
 0xf3d   :  { %v2858_v11 = vpop.eup %2857 }
 0xf3e   :  { %v796_v12 = vadd.f32 1.0, %v2858_v11  ;;  %v2860_v9 = vpop.eup %2859 }
 0xf40   :  { %2861 = vrcp.f32 %v796_v12  ;;  %v1120_v12 = vld [vmem:[%s3610_s6 + $0x10] sm:$0xff] }
 0xf4a   :  { %v2862_v13 = vpop.eup %2861 }
 0xf4b   :  { %v799_v15 = vsel %vm3242_vm4, %v2860_v9, %v2862_v13  ;;  %v1121_v9 = vld [vmem:[%s3610_s6 + $0x18] sm:$0xff] }
 0xf4c   :  { %805 = vrot.lane.b32.xlu0 %v799_v15, %s3061_s3  ;;  %v803_v18 = vmul.f32 %v801_v17, %v799_v15 }
 0xfbe   :  { %v806_v14 = vpop.permute.xlu0 %805 }
 0xfbf   :  { %v808_v16 = vmul.f32 %v806_v14, %v799_v15 }
 0xfc1   :  { %810 = vrot.lane.b32.xlu1 %v808_v16, %s3062_s20 }
0x1033   :  { %v811_v20 = vpop.permute.xlu1 %810 }
0x1034   :  { %v813_v21 = vadd.f32 %v811_v20, %v803_v18  ;;  %v1212_v20 = vld [vmem:[%s3611_s7 + $0x10] sm:$0xff] }
0x1036   :  { %2863 = vtanh.f32 %v813_v21  ;;  %v909_v41 = vrot.slane %v813_v21, 6  ;;  %v1213_v21 = vld [vmem:[%s3611_s7 + $0x18] sm:$0xff] }
0x1040   :  { %v2864_v24 = vpop.eup %2863 }
0x1041   :  { %816 = vrot.lane.b32.xlu0 %v2864_v24, %s3061_s3  ;;  %v3396_v24 = vpack.c.bf16 %v1213_v21, %v1212_v20 }
0x10b3   :  { %v817_v25 = vpop.permute.xlu0 %816 }
0x10b4   :  { %v3331_v26 = vmul.f32 %v817_v25, %v799_v15  ;;  %v2746_v15 = vpack.c.bf16 %v1121_v9, %v1120_v12 }
0x10b6   :  { %v821_v27 = vrot.slane %v3331_v26, 2 }
0x10b8   :  { %822 = vrot.lane.b32.xlu1 %v821_v27, %s3062_s20 }
0x112a   :  { %v823_v28 = vpop.permute.xlu1 %822 }
0x112b   :  { %2563 = vmatmul.mubr.msk.f32.vlgmr.msra.gmra.mrb[6].mxu1 %vm100_vm1, %v823_v28 }
0x11fe   :  { %v892_v30 = vpop.f32.mrb[6].mxu1 }
0x11ff   :  { %v897_v31 = vrot.slane %v892_v30, 4  ;;  %v2564_v32 = vpop.f32.mrb[7].mxu1 }
0x1201   :  { %v899_v33 = vadd.f32 %v897_v31, %v3237_v19 }
0x1203   :  { %v2349_v34 = vmul.f32 -1.442695, %v899_v33 }
0x1205   :  { %2865 = vpow2.f32 %v2349_v34 }
0x1206   :  { %2867 = vtanh.f32 %v899_v33 }
0x120f   :  { %v2866_v35 = vpop.eup %2865 }
0x1210   :  { %v904_v36 = vadd.f32 1.0, %v2866_v35  ;;  %v2868_v37 = vpop.eup %2867 }
0x1212   :  { %2869 = vrcp.f32 %v904_v36 }
0x121c   :  { %v2870_v38 = vpop.eup %2869 }
0x121d   :  { %v907_v39 = vsel %vm3242_vm4, %v2868_v37, %v2870_v38 }
0x121e   :  { %913 = vrot.lane.b32.xlu0 %v907_v39, %s3061_s3  ;;  %v911_v42 = vmul.f32 %v909_v41, %v907_v39 }
0x1290   :  { %v914_v40 = vpop.permute.xlu0 %913 }
0x1291   :  { %v916_v22 = vmul.f32 %v914_v40, %v907_v39 }
0x1293   :  { %918 = vrot.lane.b32.xlu1 %v916_v22, %s3062_s20 }
0x1305   :  { %v919_v43 = vpop.permute.xlu1 %918 }
0x1306   :  { %v921_v45 = vadd.f32 %v919_v43, %v911_v42 }
0x1308   :  { %2871 = vtanh.f32 %v921_v45 }
0x1312   :  { %v2872_v46 = vpop.eup %2871 }
0x1313   :  { %924 = vrot.lane.b32.xlu0 %v2872_v46, %s3061_s3 }
0x1385   :  { %v925_v47 = vpop.permute.xlu0 %924 }
0x1386   :  { %v927_v48 = vmul.f32 %v925_v47, %v907_v39 }
0x1388   :  { %v929_v49 = vrot.slane %v927_v48, 4 }
0x138a   :  { %930 = vrot.lane.b32.xlu1 %v929_v49, %s3062_s20 }
0x13fc   :  { %v931_v50 = vpop.permute.xlu1 %930 }
0x13fd   :  { %2574 = vmatmul.mubr.msk.f32.vlgmr.msra.gmra.mrb[8].mxu0 %vm100_vm1, %v931_v50 }
0x13fe   :  { %2595 = vmatprep.mubr.msk.f32.mxu0 %vm3059_vm0, %v3060_v1 }
0x14d0   :  { %v1000_v51 = vpop.f32.mrb[8].mxu0 }
0x14d1   :  { %v1005_v52 = vrot.slane %v1000_v51, 2  ;;  %v2575_v53 = vpop.f32.mrb[9].mxu0 }
0x14d3   :  { %v1007_v54 = vadd.f32 %v1005_v52, %v3237_v19  ;;  %v1017_v19 = vrot.slane %v921_v45, 6 }
0x14d5   :  { %v2351_v55 = vmul.f32 -1.442695, %v1007_v54 }
0x14d7   :  { %2873 = vpow2.f32 %v2351_v55  ;;  %v2352_v55 = vld [vmem:[%s3608_s4] ss:$0 sm:$0xff] }
0x14d8   :  { %2875 = vtanh.f32 %v1007_v54 }
0x14e1   :  { %v2874_v56 = vpop.eup %2873 }
0x14e2   :  { %v1012_v57 = vadd.f32 1.0, %v2874_v56  ;;  %v2876_v58 = vpop.eup %2875 }
0x14e4   :  { %2877 = vrcp.f32 %v1012_v57 }
0x14ee   :  { %v2878_v59 = vpop.eup %2877 }
0x14ef   :  { %v1015_v61 = vsel %vm3242_vm4, %v2876_v58, %v2878_v59  ;;  %v2353_v58 = vld [vmem:[#allocation4] ss:$0 sm:$0xff] }
0x14f0   :  { %1021 = vrot.lane.b32.xlu0 %v1015_v61, %s3061_s3  ;;  %v1019_v2 = vmul.f32 %v1017_v19, %v1015_v61 }
0x1562   :  { %v1022_v62 = vpop.permute.xlu0 %1021 }
0x1563   :  { %v1024_v63 = vmul.f32 %v1022_v62, %v1015_v61 }
0x1565   :  { %1026 = vrot.lane.b32.xlu1 %v1024_v63, %s3062_s20 }
0x1569   :  { %1039 = vrot.lane.b32.xlu1 %v3266_v60, %s3062_s20 }
0x156d   :  { %1049 = vrot.lane.b32.xlu1 %v3300_v44, %s3062_s20  ;;  %v1118_v44 = vld [vmem:[%s3610_s6] sm:$0xff] }
0x156e   :  { %v2742_v11 = vpack.c.bf16 %v1119_v8, %v1118_v44 }
0x1570   :  { %2743 = vmatprep.subr.bf16.mxu1 %v2742_v11 }
0x1571   :  { %1060 = vrot.lane.b32.xlu1 %v927_v48, %s3062_s20  ;;  %2745 = vmatpush3.bf16.msra.mxu1 %v2742_v11 }
0x1572   :  { %2747 = vmatprep.subr.bf16.mxu1 %v2746_v15 }
0x1575   :  { %2749 = vmatpush3.bf16.msra.mxu1 %v2746_v15 }
0x1576   :  { %2756 = vmatprep.subr.bf16.mxu1 %v3058_v0 }
0x15d7   :  { %v1027_v3 = vpop.permute.xlu1 %1026 }
0x15d8   :  { %v1029_v4 = vadd.f32 %v1027_v3, %v1019_v2  ;;  %v2354_v3 = vld [vmem:[%s3612_s8] ss:$0 sm:$0xff] }
0x15da   :  { %2879 = vtanh.f32 %v1029_v4 }
0x15db   :  { %v1040_v5 = vpop.permute.xlu1 %1039 }
0x15dc   :  { %1043 = vst.msk [vmem:[#allocation2] sm:$0xc] %vm1042_vm6, %v1040_v5 }
0x15df   :  { %v1050_v6 = vpop.permute.xlu1 %1049 }
0x15e0   :  { %1053 = vst.msk [vmem:[#allocation2] sm:$0xc0] %vm1052_vm7, %v1050_v6 }
0x15e3   :  { %v1061_v60 = vpop.permute.xlu1 %1060 }
0x15e4   :  { %v2880_v7 = vpop.eup %2879  ;;  %1063 = vst.msk [vmem:[#allocation2 + $0x8] sm:$0x30] %vm1047_vm8, %v1061_v60 }
0x15e5   :  { %1032 = vrot.lane.b32.xlu0 %v2880_v7, %s3061_s3 }
0x15e9   :  { %1044 = vrot.lane.b32.xlu0 %v3283_v23, %s3062_s20  ;;  %v1211_v23 = vld [vmem:[%s3611_s7 + $0x8] sm:$0xff] }
0x15ea   :  { %v3382_v13 = vpack.c.bf16 %v1211_v23, %v1210_v10 }
0x15ec   :  { %2752 = vmatpush3.bf16.msra.mxu0 %v3382_v13 }
0x15ed   :  { %1056 = vrot.lane.b32.xlu0 %v3331_v26, %s3062_s20  ;;  %2753 = vmatprep.subr.bf16.mxu0 %v3058_v0 }
0x15f0   :  { %2755 = vmatpush3.bf16.msra.mxu0 %v3396_v24 }
0x15f1   :  { %2762 = vmatprep.subr.bf16.mxu0 %v3058_v0 }
0x15f3   :  { %2596 = vmatmul.mubr.f32.vlgmr.msra.gmra.mrb[10].mxu0 %v3060_v1 }
0x15f4   :  { %2764 = vmatpush3.bf16.msra.mxu0 %v3382_v13  ;;  %2617 = vmatprep.mubr.msk.f32.mxu0 %vm3059_vm0, %v3060_v1 }
0x15f5   :  { %2765 = vmatprep.subr.bf16.mxu0 %v3058_v0 }
0x15f8   :  { %2767 = vmatpush3.bf16.msra.mxu0 %v3396_v24 }
0x15f9   :  { %2774 = vmatprep.subr.bf16.mxu0 %v3058_v0 }
0x1657   :  { %v1033_v14 = vpop.permute.xlu0 %1032 }
0x1658   :  { %v1035_v16 = vmul.f32 %v1033_v14, %v1015_v61 }
0x165a   :  { %1065 = vrot.lane.b32.xlu0 %v1035_v16, %s3062_s20 }
0x165b   :  { %v1045_v17 = vpop.permute.xlu0 %1044 }
0x165c   :  { %1048 = vst.msk [vmem:[#allocation2] sm:$0x30] %vm1047_vm8, %v1045_v17 }
0x165f   :  { %v1057_v18 = vpop.permute.xlu0 %1056 }
0x1660   :  { %1059 = vst.msk [vmem:[#allocation2 + $0x8] sm:$0xc] %vm1042_vm6, %v1057_v18 }
0x1663   :  { %v1069_v26 = vld [vmem:[#allocation2] sm:$0xff] }
0x1664   :  { %v1073_v28 = vsel %vm100_vm1, %v1069_v26, 0.0 }
0x16c6   :  { %v1280_v19 = vpop.f32.mrb[10].mxu0 }
0x16c7   :  { %v2597_v2 = vpop.f32.mrb[11].mxu0 }
0x16cc   :  { %v1066_v25 = vpop.permute.xlu0 %1065 }
0x16cd   :  { %1068 = vst.msk [vmem:[#allocation2 + $0x8] sm:$0xc0] %vm1052_vm7, %v1066_v25 }
0x16d4   :  { %v1070_v27 = vld [vmem:[#allocation2 + $0x8] sm:$0xff] }
0x16d5   :  { %v1074_v30 = vsel %vm100_vm1, %v1070_v27, 0.0 }
0x16d6   :  { %v1075_v31 = vadd.f32 %v1074_v30, %v1073_v28 }
0x16d8   :  { %v1076_v32 = vrot.slane %v1075_v31, 4 }
0x16da   :  { %v1077_v33 = vadd.f32 %v1076_v32, %v1075_v31 }
0x16dc   :  { %v1078_v34 = vrot.slane %v1077_v33, 2 }
0x16de   :  { %v1079_v35 = vadd.f32 %v1078_v34, %v1077_v33 }
0x16e0   :  { %v1080_v36 = vrot.slane %v1079_v35, 1 }
0x16e2   :  { %v1081_v37 = vadd.f32 %v1080_v36, %v1079_v35 }
0x16e4   :  { %v1083_v38 = vmul.f32 0.0625, %v1081_v37 }
0x16e6   :  { %v1084_v39 = vsub.f32 %v1069_v26, %v1083_v38  ;;  %v1085_v40 = vsub.f32 %v1070_v27, %v1083_v38 }
0x16e8   :  { %v1086_v22 = vmul.f32 %v1084_v39, %v1084_v39  ;;  %v1087_v41 = vmul.f32 %v1085_v40, %v1085_v40 }
0x16ea   :  { %v1088_v42 = vsel %vm100_vm1, %v1086_v22, 0.0  ;;  %v1089_v43 = vsel %vm100_vm1, %v1087_v41, 0.0 }
0x16eb   :  { %v1090_v45 = vadd.f32 %v1089_v43, %v1088_v42 }
0x16ed   :  { %v1091_v46 = vrot.slane %v1090_v45, 4 }
0x16ef   :  { %v1092_v47 = vadd.f32 %v1091_v46, %v1090_v45 }
0x16f1   :  { %v1093_v48 = vrot.slane %v1092_v47, 2 }
0x16f3   :  { %v1094_v49 = vadd.f32 %v1093_v48, %v1092_v47 }
0x16f5   :  { %v1095_v50 = vrot.slane %v1094_v49, 1 }
0x16f7   :  { %v1096_v51 = vadd.f32 %v1095_v50, %v1094_v49 }
0x16f9   :  { %v1097_v52 = vmul.f32 0.0625, %v1096_v51 }
0x16fb   :  { %v1098_v53 = vadd.f32 1e-05, %v1097_v52 }
0x16fd   :  { %2881 = vrsqrt.f32 %v1098_v53 }
0x1707   :  { %v2882_v54 = vpop.eup %2881 }
0x1708   :  { %v1100_v56 = vmul.f32 %v2882_v54, %v1084_v39  ;;  %v1101_v57 = vmul.f32 %v2882_v54, %v1085_v40 }
0x170a   :  { %v1108_v59 = vmul.f32 %v2352_v55, %v1100_v56  ;;  %v1109_v61 = vmul.f32 %v2352_v55, %v1101_v57 }
0x170c   :  { %v1116_v62 = vadd.f32 %v2353_v58, %v1108_v59  ;;  %v1117_v63 = vadd.f32 %v2353_v58, %v1109_v61 }
0x170e   :  { %2584 = vmatprep.mubr.msk.f32.mxu1 %vm100_vm1, %v1116_v62 }
0x170f   :  { %2585 = vmatmul.mubr.msk.f32.vlgmr.msra.gmra.mrb[8].mxu1 %vm100_vm1, %v1117_v63 }
0x1710   :  { %2758 = vmatpush3.bf16.msra.mxu1 %v3382_v13  ;;  %2606 = vmatprep.mubr.msk.f32.mxu1 %vm3059_vm0, %v3060_v1 }
0x1711   :  { %2759 = vmatprep.subr.bf16.mxu1 %v3058_v0 }
0x1714   :  { %2761 = vmatpush3.bf16.msra.mxu1 %v3396_v24 }
0x1715   :  { %2768 = vmatprep.subr.bf16.mxu1 %v3058_v0 }
0x17e2   :  { %v2586_v4 = vpop.f32.mrb[8].mxu1 }
0x17e3   :  { %v3426_v5 = vadd.f32 %v2586_v4, %v2354_v3  ;;  %v1201_v6 = vpop.f32.mrb[9].mxu1 }
0x17e4   :  { %v3428_v60 = vadd.f32 %v2354_v3, %v1201_v6 }
0x17e6   :  { %v1284_v7 = vadd.f32 %v1280_v19, %v3428_v60 }
0x17e8   :  { %v2357_v44 = vmul.f32 -1.442695, %v1284_v7 }
0x17ea   :  { %2883 = vpow2.f32 %v2357_v44 }
0x17eb   :  { %2885 = vtanh.f32 %v1284_v7 }
0x17f4   :  { %v2884_v8 = vpop.eup %2883 }
0x17f5   :  { %v1289_v10 = vadd.f32 1.0, %v2884_v8  ;;  %v2886_v11 = vpop.eup %2885 }
0x17f7   :  { %2887 = vrcp.f32 %v1289_v10 }
0x1801   :  { %v2888_v23 = vpop.eup %2887 }
0x1802   :  { %v1292_v12 = vsel %vm3242_vm4, %v2886_v11, %v2888_v23 }
0x1803   :  { %1295 = vrot.lane.b32.xlu1 %v1292_v12, %s3061_s3  ;;  %v1293_v14 = vmul.f32 0.0, %v1292_v12 }
0x1875   :  { %v1296_v9 = vpop.permute.xlu1 %1295 }
0x1876   :  { %v1298_v15 = vmul.f32 %v1296_v9, %v1292_v12 }
0x1878   :  { %1300 = vrot.lane.b32.xlu0 %v1298_v15, %s3062_s20 }
0x18ea   :  { %v1301_v16 = vpop.permute.xlu0 %1300 }
0x18eb   :  { %v1303_v17 = vadd.f32 %v1301_v16, %v1293_v14 }
0x18ed   :  { %2889 = vtanh.f32 %v1303_v17  ;;  %v1398_v39 = vrot.slane %v1303_v17, 6 }
0x18f7   :  { %v2890_v18 = vpop.eup %2889 }
0x18f8   :  { %1306 = vrot.lane.b32.xlu1 %v2890_v18, %s3061_s3 }
0x196a   :  { %v1307_v20 = vpop.permute.xlu1 %1306 }
0x196b   :  { %v1309_v21 = vmul.f32 %v1307_v20, %v1292_v12 }
0x196d   :  { %1311 = vrot.lane.b32.xlu0 %v1309_v21, %s3062_s20 }
0x19df   :  { %v1312_v25 = vpop.permute.xlu0 %1311 }
0x19e0   :  { %2064 = vst.msk [vmem:[#allocation3] sm:$0x3] %vm1037_vm5, %v1312_v25  ;;  %2607 = vmatmul.mubr.msk.f32.vlgmr.msra.gmra.mrb[10].mxu1 %vm100_vm1, %v1312_v25 }
0x19e1   :  { %2770 = vmatpush3.bf16.msra.mxu1 %v3382_v13  ;;  %2628 = vmatprep.mubr.msk.f32.mxu1 %vm3059_vm0, %v3060_v1 }
0x19e2   :  { %2771 = vmatprep.subr.bf16.mxu1 %v3058_v0 }
0x19e5   :  { %2773 = vmatpush3.bf16.msra.mxu1 %v3396_v24 }
0x19e6   :  { %2780 = vmatprep.subr.bf16.mxu1 %v3058_v0 }
0x1ab3   :  { %v1381_v26 = vpop.f32.mrb[10].mxu1 }
0x1ab4   :  { %v1386_v27 = vrot.slane %v1381_v26, 6  ;;  %v2608_v28 = vpop.f32.mrb[11].mxu1 }
0x1ab6   :  { %v1388_v30 = vadd.f32 %v1386_v27, %v3428_v60 }
0x1ab8   :  { %v2359_v31 = vmul.f32 -1.442695, %v1388_v30 }
0x1aba   :  { %2891 = vpow2.f32 %v2359_v31 }
0x1abb   :  { %2893 = vtanh.f32 %v1388_v30 }
0x1ac4   :  { %v2892_v32 = vpop.eup %2891 }
0x1ac5   :  { %v1393_v33 = vadd.f32 1.0, %v2892_v32  ;;  %v2894_v34 = vpop.eup %2893 }
0x1ac7   :  { %2895 = vrcp.f32 %v1393_v33 }
0x1ad1   :  { %v2896_v35 = vpop.eup %2895 }
0x1ad2   :  { %v1396_v36 = vsel %vm3242_vm4, %v2894_v34, %v2896_v35 }
0x1ad3   :  { %1402 = vrot.lane.b32.xlu1 %v1396_v36, %s3061_s3  ;;  %v1400_v40 = vmul.f32 %v1398_v39, %v1396_v36 }
0x1b45   :  { %v1403_v37 = vpop.permute.xlu1 %1402 }
0x1b46   :  { %v1405_v38 = vmul.f32 %v1403_v37, %v1396_v36 }
0x1b48   :  { %1407 = vrot.lane.b32.xlu0 %v1405_v38, %s3062_s20 }
0x1bba   :  { %v1408_v22 = vpop.permute.xlu0 %1407 }
0x1bbb   :  { %v1410_v41 = vadd.f32 %v1408_v22, %v1400_v40 }
0x1bbd   :  { %2897 = vtanh.f32 %v1410_v41  ;;  %v1506_v61 = vrot.slane %v1410_v41, 6 }
0x1bc7   :  { %v2898_v42 = vpop.eup %2897 }
0x1bc8   :  { %1413 = vrot.lane.b32.xlu1 %v2898_v42, %s3061_s3 }
0x1c3a   :  { %v1414_v43 = vpop.permute.xlu1 %1413 }
0x1c3b   :  { %v3451_v45 = vmul.f32 %v1414_v43, %v1396_v36 }
0x1c3d   :  { %v1418_v46 = vrot.slane %v3451_v45, 2 }
0x1c3f   :  { %1419 = vrot.lane.b32.xlu0 %v1418_v46, %s3062_s20 }
0x1cb1   :  { %v1420_v47 = vpop.permute.xlu0 %1419 }
0x1cb2   :  { %2618 = vmatmul.mubr.msk.f32.vlgmr.msra.gmra.mrb[12].mxu0 %vm100_vm1, %v1420_v47 }
0x1cb3   :  { %2776 = vmatpush3.bf16.msra.mxu0 %v3382_v13  ;;  %2639 = vmatprep.mubr.msk.f32.mxu0 %vm3059_vm0, %v3060_v1 }
0x1cb4   :  { %2777 = vmatprep.subr.bf16.mxu0 %v3058_v0 }
0x1cb7   :  { %2779 = vmatpush3.bf16.msra.mxu0 %v3396_v24 }
0x1cb8   :  { %2786 = vmatprep.subr.bf16.mxu0 %v3058_v0 }
0x1d85   :  { %v1489_v48 = vpop.f32.mrb[12].mxu0 }
0x1d86   :  { %v1494_v49 = vrot.slane %v1489_v48, 4  ;;  %v2619_v50 = vpop.f32.mrb[13].mxu0 }
0x1d88   :  { %v1496_v51 = vadd.f32 %v1494_v49, %v3428_v60 }
0x1d8a   :  { %v2361_v52 = vmul.f32 -1.442695, %v1496_v51 }
0x1d8c   :  { %2899 = vpow2.f32 %v2361_v52 }
0x1d8d   :  { %2901 = vtanh.f32 %v1496_v51 }
0x1d96   :  { %v2900_v53 = vpop.eup %2899 }
0x1d97   :  { %v1501_v54 = vadd.f32 1.0, %v2900_v53  ;;  %v2902_v55 = vpop.eup %2901 }
0x1d99   :  { %2903 = vrcp.f32 %v1501_v54 }
0x1da3   :  { %v2904_v56 = vpop.eup %2903 }
0x1da4   :  { %v1504_v57 = vsel %vm3242_vm4, %v2902_v55, %v2904_v56 }
0x1da5   :  { %1510 = vrot.lane.b32.xlu1 %v1504_v57, %s3061_s3  ;;  %v1508_v62 = vmul.f32 %v1506_v61, %v1504_v57 }
0x1e17   :  { %v1511_v58 = vpop.permute.xlu1 %1510 }
0x1e18   :  { %v1513_v59 = vmul.f32 %v1511_v58, %v1504_v57 }
0x1e1a   :  { %1515 = vrot.lane.b32.xlu0 %v1513_v59, %s3062_s20 }
0x1e8c   :  { %v1516_v63 = vpop.permute.xlu0 %1515 }
0x1e8d   :  { %v1518_v19 = vadd.f32 %v1516_v63, %v1508_v62 }
0x1e8f   :  { %2905 = vtanh.f32 %v1518_v19  ;;  %v1614_v20 = vrot.slane %v1518_v19, 6 }
0x1e99   :  { %v2906_v2 = vpop.eup %2905 }
0x1e9a   :  { %1521 = vrot.lane.b32.xlu1 %v2906_v2, %s3061_s3 }
0x1f0c   :  { %v1522_v3 = vpop.permute.xlu1 %1521 }
0x1f0d   :  { %v3468_v4 = vmul.f32 %v1522_v3, %v1504_v57 }
0x1f0f   :  { %v1526_v6 = vrot.slane %v3468_v4, 4 }
0x1f11   :  { %1527 = vrot.lane.b32.xlu0 %v1526_v6, %s3062_s20 }
0x1f83   :  { %v1528_v7 = vpop.permute.xlu0 %1527 }
0x1f84   :  { %2629 = vmatmul.mubr.msk.f32.vlgmr.msra.gmra.mrb[12].mxu1 %vm100_vm1, %v1528_v7 }
0x1f85   :  { %2782 = vmatpush3.bf16.msra.mxu1 %v3382_v13  ;;  %2650 = vmatprep.mubr.msk.f32.mxu1 %vm3059_vm0, %v3060_v1 }
0x1f86   :  { %2783 = vmatprep.subr.bf16.mxu1 %v3058_v0 }
0x1f89   :  { %2785 = vmatpush3.bf16.msra.mxu1 %v3396_v24 }
0x1f8a   :  { %2792 = vmatprep.subr.bf16.mxu1 %v3058_v0 }
0x2057   :  { %v1597_v44 = vpop.f32.mrb[12].mxu1 }
0x2058   :  { %v1602_v8 = vrot.slane %v1597_v44, 2  ;;  %v2630_v10 = vpop.f32.mrb[13].mxu1 }
0x205a   :  { %v1604_v11 = vadd.f32 %v1602_v8, %v3428_v60 }
0x205c   :  { %v2363_v23 = vmul.f32 -1.442695, %v1604_v11 }
0x205e   :  { %2907 = vpow2.f32 %v2363_v23 }
0x205f   :  { %2909 = vtanh.f32 %v1604_v11 }
0x2068   :  { %v2908_v12 = vpop.eup %2907 }
0x2069   :  { %v1609_v9 = vadd.f32 1.0, %v2908_v12  ;;  %v2910_v15 = vpop.eup %2909 }
0x206b   :  { %2911 = vrcp.f32 %v1609_v9 }
0x2075   :  { %v2912_v14 = vpop.eup %2911 }
0x2076   :  { %v1612_v16 = vsel %vm3242_vm4, %v2910_v15, %v2912_v14 }
0x2077   :  { %1618 = vrot.lane.b32.xlu1 %v1612_v16, %s3061_s3  ;;  %v1616_v21 = vmul.f32 %v1614_v20, %v1612_v16 }
0x20e9   :  { %v1619_v17 = vpop.permute.xlu1 %1618 }
0x20ea   :  { %v1621_v18 = vmul.f32 %v1619_v17, %v1612_v16 }
0x20ec   :  { %1623 = vrot.lane.b32.xlu0 %v1621_v18, %s3062_s20 }
0x215e   :  { %v1624_v60 = vpop.permute.xlu0 %1623 }
0x215f   :  { %v1626_v25 = vadd.f32 %v1624_v60, %v1616_v21 }
0x2161   :  { %2913 = vtanh.f32 %v1626_v25  ;;  %v1719_v42 = vrot.slane %v1626_v25, 6 }
0x216b   :  { %v2914_v26 = vpop.eup %2913 }
0x216c   :  { %1629 = vrot.lane.b32.xlu1 %v2914_v26, %s3061_s3 }
0x21de   :  { %v1630_v27 = vpop.permute.xlu1 %1629 }
0x21df   :  { %v3485_v28 = vmul.f32 %v1630_v27, %v1612_v16 }
0x21e1   :  { %v1634_v30 = vrot.slane %v3485_v28, 6 }
0x21e3   :  { %1635 = vrot.lane.b32.xlu0 %v1634_v30, %s3062_s20 }
0x2255   :  { %v1636_v31 = vpop.permute.xlu0 %1635 }
0x2256   :  { %2640 = vmatmul.mubr.msk.f32.vlgmr.msra.gmra.mrb[14].mxu0 %vm100_vm1, %v1636_v31 }
0x2257   :  { %2788 = vmatpush3.bf16.msra.mxu0 %v3382_v13  ;;  %2661 = vmatprep.mubr.msk.f32.mxu0 %vm3059_vm0, %v3060_v1 }
0x2258   :  { %2789 = vmatprep.subr.bf16.mxu0 %v3058_v0 }
0x225b   :  { %2791 = vmatpush3.bf16.msra.mxu0 %v3396_v24 }
0x2329   :  { %v1705_v32 = vpop.f32.mrb[14].mxu0 }
0x232a   :  { %v1709_v33 = vadd.f32 %v1705_v32, %v3426_v5  ;;  %v2641_v34 = vpop.f32.mrb[15].mxu0 }
0x232c   :  { %v2365_v35 = vmul.f32 -1.442695, %v1709_v33 }
0x232e   :  { %2915 = vpow2.f32 %v2365_v35 }
0x232f   :  { %2917 = vtanh.f32 %v1709_v33 }
0x2338   :  { %v2916_v36 = vpop.eup %2915 }
0x2339   :  { %v1714_v37 = vadd.f32 1.0, %v2916_v36  ;;  %v2918_v38 = vpop.eup %2917 }
0x233b   :  { %2919 = vrcp.f32 %v1714_v37 }
0x2345   :  { %v2920_v39 = vpop.eup %2919 }
0x2346   :  { %v1717_v40 = vsel %vm3242_vm4, %v2918_v38, %v2920_v39 }
0x2347   :  { %1723 = vrot.lane.b32.xlu1 %v1717_v40, %s3061_s3  ;;  %v1721_v43 = vmul.f32 %v1719_v42, %v1717_v40 }
0x23b9   :  { %v1724_v22 = vpop.permute.xlu1 %1723 }
0x23ba   :  { %v1726_v41 = vmul.f32 %v1724_v22, %v1717_v40 }
0x23bc   :  { %1728 = vrot.lane.b32.xlu0 %v1726_v41, %s3062_s20 }
0x242e   :  { %v1729_v46 = vpop.permute.xlu0 %1728 }
0x242f   :  { %v1731_v47 = vadd.f32 %v1729_v46, %v1721_v43 }
0x2431   :  { %2921 = vtanh.f32 %v1731_v47  ;;  %v1826_v62 = vrot.slane %v1731_v47, 6 }
0x243b   :  { %v2922_v48 = vpop.eup %2921 }
0x243c   :  { %1734 = vrot.lane.b32.xlu1 %v2922_v48, %s3061_s3 }
0x24ae   :  { %v1735_v49 = vpop.permute.xlu1 %1734 }
0x24af   :  { %v1737_v50 = vmul.f32 %v1735_v49, %v1717_v40 }
0x24b1   :  { %1739 = vrot.lane.b32.xlu0 %v1737_v50, %s3062_s20 }
0x2523   :  { %v1740_v51 = vpop.permute.xlu0 %1739 }
0x2524   :  { %2078 = vst.msk [vmem:[#allocation3 + $0x8] sm:$0x3] %vm1037_vm5, %v1740_v51  ;;  %2651 = vmatmul.mubr.msk.f32.vlgmr.msra.gmra.mrb[14].mxu1 %vm100_vm1, %v1740_v51 }
0x2525   :  { %2794 = vmatpush3.bf16.msra.mxu1 %v3382_v13  ;;  %2672 = vmatprep.mubr.msk.f32.mxu1 %vm3059_vm0, %v3060_v1 }
0x2526   :  { %2795 = vmatprep.subr.bf16.mxu1 %v3058_v0 }
0x2529   :  { %2797 = vmatpush3.bf16.msra.mxu1 %v3396_v24 }
0x25f7   :  { %v1809_v52 = vpop.f32.mrb[14].mxu1 }
0x25f8   :  { %v1814_v53 = vrot.slane %v1809_v52, 6  ;;  %v2652_v54 = vpop.f32.mrb[15].mxu1 }
0x25f9   :  { %v2196_v54 = vld [vmem:[%s3616_s12 + $0x10] sm:$0xff] }
0x25fa   :  { %v1816_v55 = vadd.f32 %v1814_v53, %v3426_v5 }
0x25fc   :  { %v2367_v56 = vmul.f32 -1.442695, %v1816_v55 }
0x25fe   :  { %2923 = vpow2.f32 %v2367_v56 }
0x25ff   :  { %2925 = vtanh.f32 %v1816_v55 }
0x2608   :  { %v2924_v57 = vpop.eup %2923 }
0x2609   :  { %v1821_v58 = vadd.f32 1.0, %v2924_v57  ;;  %v2926_v59 = vpop.eup %2925 }
0x260b   :  { %2927 = vrcp.f32 %v1821_v58 }
0x2615   :  { %v2928_v13 = vpop.eup %2927 }
0x2616   :  { %v1824_v61 = vsel %vm3242_vm4, %v2926_v59, %v2928_v13 }
0x2617   :  { %1830 = vrot.lane.b32.xlu1 %v1824_v61, %s3061_s3  ;;  %v1828_v63 = vmul.f32 %v1826_v62, %v1824_v61 }
0x2689   :  { %v1831_v0 = vpop.permute.xlu1 %1830 }
0x268a   :  { %v1833_v24 = vmul.f32 %v1831_v0, %v1824_v61 }
0x268c   :  { %1835 = vrot.lane.b32.xlu0 %v1833_v24, %s3062_s20  ;;  %v2373_v24 = vld [vmem:[%s3613_s9 + $0x1] ss:$0 sm:$0xff] }
0x26fe   :  { %v1836_v19 = vpop.permute.xlu0 %1835 }
0x26ff   :  { %v1838_v2 = vadd.f32 %v1836_v19, %v1828_v63  ;;  %v2374_v63 = vld [vmem:[%s3613_s9 + $0x2] ss:$0 sm:$0xff] }
0x2701   :  { %2929 = vtanh.f32 %v1838_v2  ;;  %v1934_v60 = vrot.slane %v1838_v2, 6 }
0x270b   :  { %v2930_v3 = vpop.eup %2929 }
0x270c   :  { %1841 = vrot.lane.b32.xlu1 %v2930_v3, %s3061_s3 }
0x277e   :  { %v1842_v6 = vpop.permute.xlu1 %1841 }
0x277f   :  { %v3515_v7 = vmul.f32 %v1842_v6, %v1824_v61  ;;  %v2094_v61 = vld [vmem:[#allocation3 + $0x10] sm:$0xf] }
0x2780   :  { %v2109_v62 = vmul.f32 %v2373_v24, %v2094_v61  ;;  %v2130_v2 = vmul.f32 %v2374_v63, %v2094_v61  ;;  %v2372_v6 = vld [vmem:[%s3613_s9] ss:$0 sm:$0xff] }
0x2781   :  { %v1846_v44 = vrot.slane %v3515_v7, 2 }
0x2783   :  { %1847 = vrot.lane.b32.xlu0 %v1846_v44, %s3062_s20  ;;  %v2117_v44 = vrot.slane %v2109_v62, 2 }
0x27f5   :  { %v1848_v8 = vpop.permute.xlu0 %1847 }
0x27f6   :  { %2662 = vmatmul.mubr.msk.f32.vlgmr.msra.gmra.mrb[16].mxu0 %vm100_vm1, %v1848_v8 }
0x28c9   :  { %v1917_v10 = vpop.f32.mrb[16].mxu0 }
0x28ca   :  { %v1922_v11 = vrot.slane %v1917_v10, 4  ;;  %v2663_v23 = vpop.f32.mrb[17].mxu0 }
0x28cc   :  { %v1924_v12 = vadd.f32 %v1922_v11, %v3426_v5 }
0x28ce   :  { %v2369_v9 = vmul.f32 -1.442695, %v1924_v12 }
0x28d0   :  { %2931 = vpow2.f32 %v2369_v9  ;;  %v2138_v9 = vrot.slane %v2130_v2, 4 }
0x28d1   :  { %2933 = vtanh.f32 %v1924_v12 }
0x28da   :  { %v2932_v15 = vpop.eup %2931 }
0x28db   :  { %v1929_v14 = vadd.f32 1.0, %v2932_v15  ;;  %v2934_v16 = vpop.eup %2933 }
0x28dd   :  { %2935 = vrcp.f32 %v1929_v14 }
0x28e7   :  { %v2936_v17 = vpop.eup %2935 }
0x28e8   :  { %v1932_v18 = vsel %vm3242_vm4, %v2934_v16, %v2936_v17 }
0x28e9   :  { %1938 = vrot.lane.b32.xlu1 %v1932_v18, %s3061_s3  ;;  %v1936_v25 = vmul.f32 %v1934_v60, %v1932_v18 }
0x295b   :  { %v1939_v20 = vpop.permute.xlu1 %1938 }
0x295c   :  { %v1941_v21 = vmul.f32 %v1939_v20, %v1932_v18 }
0x295e   :  { %1943 = vrot.lane.b32.xlu0 %v1941_v21, %s3062_s20 }
0x29d0   :  { %v1944_v26 = vpop.permute.xlu0 %1943 }
0x29d1   :  { %v1946_v27 = vadd.f32 %v1944_v26, %v1936_v25 }
0x29d3   :  { %2937 = vtanh.f32 %v1946_v27 }
0x29dd   :  { %v2938_v30 = vpop.eup %2937 }
0x29de   :  { %1949 = vrot.lane.b32.xlu1 %v2938_v30, %s3061_s3 }
0x2a50   :  { %v1950_v31 = vpop.permute.xlu1 %1949 }
0x2a51   :  { %v1952_v32 = vmul.f32 %v1950_v31, %v1932_v18 }
0x2a53   :  { %v1954_v33 = vrot.slane %v1952_v32, 4 }
0x2a55   :  { %1955 = vrot.lane.b32.xlu0 %v1954_v33, %s3062_s20 }
0x2ac7   :  { %v1956_v34 = vpop.permute.xlu0 %1955 }
0x2ac8   :  { %2673 = vmatmul.mubr.msk.f32.vlgmr.msra.gmra.mrb[16].mxu1 %vm100_vm1, %v1956_v34 }
0x2b9b   :  { %v2025_v35 = vpop.f32.mrb[16].mxu1 }
0x2b9c   :  { %v2030_v36 = vrot.slane %v2025_v35, 2  ;;  %v2674_v37 = vpop.f32.mrb[17].mxu1 }
0x2b9e   :  { %v2032_v38 = vadd.f32 %v2030_v36, %v3426_v5  ;;  %v2042_v5 = vrot.slane %v1946_v27, 6 }
0x2ba0   :  { %v2371_v39 = vmul.f32 -1.442695, %v2032_v38 }
0x2ba2   :  { %2939 = vpow2.f32 %v2371_v39 }
0x2ba3   :  { %2941 = vtanh.f32 %v2032_v38 }
0x2bac   :  { %v2940_v40 = vpop.eup %2939 }
0x2bad   :  { %v2037_v22 = vadd.f32 1.0, %v2940_v40  ;;  %v2942_v41 = vpop.eup %2941 }
0x2baf   :  { %2943 = vrcp.f32 %v2037_v22 }
0x2bb9   :  { %v2944_v42 = vpop.eup %2943 }
0x2bba   :  { %v2040_v43 = vsel %vm3242_vm4, %v2942_v41, %v2944_v42 }
0x2bbb   :  { %2046 = vrot.lane.b32.xlu1 %v2040_v43, %s3061_s3  ;;  %v2044_v48 = vmul.f32 %v2042_v5, %v2040_v43 }
0x2c2d   :  { %v2047_v46 = vpop.permute.xlu1 %2046 }
0x2c2e   :  { %v2049_v47 = vmul.f32 %v2047_v46, %v2040_v43 }
0x2c30   :  { %2051 = vrot.lane.b32.xlu0 %v2049_v47, %s3062_s20 }
0x2c34   :  { %2065 = vrot.lane.b32.xlu0 %v3451_v45, %s3062_s20  ;;  %v2194_v45 = vld [vmem:[%s3616_s12] sm:$0xff] }
0x2c38   :  { %2073 = vrot.lane.b32.xlu0 %v3485_v28, %s3062_s20  ;;  %v2195_v28 = vld [vmem:[%s3616_s12 + $0x8] sm:$0xff] }
0x2c39   :  { %v2798_v55 = vpack.c.bf16 %v2195_v28, %v2194_v45 }
0x2c3b   :  { %2799 = vmatprep.subr.bf16.mxu0 %v2798_v55 }
0x2c3c   :  { %2083 = vrot.lane.b32.xlu0 %v1952_v32, %s3062_s20  ;;  %2801 = vmatpush3.bf16.msra.mxu0 %v2798_v55 }
0x2ca2   :  { %v2052_v49 = vpop.permute.xlu0 %2051 }
0x2ca3   :  { %v2054_v50 = vadd.f32 %v2052_v49, %v2044_v48 }
0x2ca5   :  { %2945 = vtanh.f32 %v2054_v50 }
0x2ca6   :  { %v2066_v29 = vpop.permute.xlu0 %2065 }
0x2ca7   :  { %2068 = vst.msk [vmem:[#allocation3] sm:$0xc] %vm1042_vm6, %v2066_v29 }
0x2caa   :  { %v2074_v51 = vpop.permute.xlu0 %2073 }
0x2cab   :  { %2076 = vst.msk [vmem:[#allocation3] sm:$0xc0] %vm1052_vm7, %v2074_v51 }
0x2cae   :  { %v2084_v52 = vpop.permute.xlu0 %2083 }
0x2caf   :  { %v2946_v53 = vpop.eup %2945  ;;  %2086 = vst.msk [vmem:[#allocation3 + $0x8] sm:$0x30] %vm1047_vm8, %v2084_v52 }
0x2cb0   :  { %2057 = vrot.lane.b32.xlu1 %v2946_v53, %s3061_s3 }
0x2cb4   :  { %2069 = vrot.lane.b32.xlu1 %v3468_v4, %s3062_s20  ;;  %v2197_v4 = vld [vmem:[%s3616_s12 + $0x18] sm:$0xff] }
0x2cb5   :  { %v2802_v56 = vpack.c.bf16 %v2197_v4, %v2196_v54 }
0x2cb7   :  { %2803 = vmatprep.subr.bf16.mxu0 %v2802_v56 }
0x2cb8   :  { %2079 = vrot.lane.b32.xlu1 %v3515_v7, %s3062_s20  ;;  %2805 = vmatpush3.bf16.msra.mxu0 %v2802_v56  ;;  %v2375_v56 = vld [vmem:[#allocation7] ss:$0 sm:$0xff] }
0x2d22   :  { %v2058_v57 = vpop.permute.xlu1 %2057 }
0x2d23   :  { %v2060_v58 = vmul.f32 %v2058_v57, %v2040_v43 }
0x2d25   :  { %2088 = vrot.lane.b32.xlu1 %v2060_v58, %s3062_s20 }
0x2d26   :  { %v2070_v59 = vpop.permute.xlu1 %2069 }
0x2d27   :  { %2072 = vst.msk [vmem:[#allocation3] sm:$0x30] %vm1047_vm8, %v2070_v59  ;;  %v2376_v59 = vld [vmem:[#allocation9] ss:$0 sm:$0xff] }
0x2d2a   :  { %v2080_v13 = vpop.permute.xlu1 %2079 }
0x2d2b   :  { %2082 = vst.msk [vmem:[#allocation3 + $0x8] sm:$0xc] %vm1042_vm6, %v2080_v13 }
0x2d2e   :  { %v2092_v0 = vld [vmem:[#allocation3] sm:$0xff] }
0x2d2f   :  { %v2107_v19 = vmul.f32 %v2373_v24, %v2092_v0  ;;  %v2128_v8 = vmul.f32 %v2374_v63, %v2092_v0  ;;  %v2100_v15 = vmul.f32 %v2372_v6, %v2092_v0 }
0x2d31   :  { %v2114_v11 = vrot.slane %v2107_v19, 2  ;;  %v2135_v18 = vrot.slane %v2128_v8, 4 }
0x2d97   :  { %v2089_v1 = vpop.permute.xlu1 %2088 }
0x2d98   :  { %2091 = vst.msk [vmem:[#allocation3 + $0x8] sm:$0xc0] %vm1052_vm7, %v2089_v1 }
0x2d9f   :  { %v2093_v3 = vld [vmem:[#allocation3 + $0x8] sm:$0xff] }
0x2da0   :  { %v2108_v7 = vmul.f32 %v2373_v24, %v2093_v3  ;;  %v2129_v10 = vmul.f32 %v2374_v63, %v2093_v3  ;;  %v2101_v14 = vmul.f32 %v2372_v6, %v2093_v3 }
0x2da2   :  { %v2115_v23 = vrot.slane %v2108_v7, 2  ;;  %v2136_v12 = vrot.slane %v2129_v10, 4 }
0x2da4   :  { %v2116_v16 = vsel %vm2113_vm10, %v2114_v11, %v2115_v23  ;;  %v2118_v17 = vsel %vm2113_vm10, %v2115_v23, %v2117_v44  ;;  %v2137_v60 = vsel %vm2134_vm11, %v2135_v18, %v2136_v12  ;;  %v2139_v25 = vsel %vm2134_vm11, %v2136_v12, %v2138_v9 }
0x2da5   :  { %v2121_v20 = vadd.f32 %v2116_v16, %v2100_v15  ;;  %v2122_v21 = vadd.f32 %v2118_v17, %v2101_v14 }
0x2da7   :  { %v2142_v26 = vadd.f32 %v2137_v60, %v2121_v20  ;;  %v2143_v27 = vadd.f32 %v2139_v25, %v2122_v21 }
0x2da9   :  { %v2144_v30 = vmax.f32 %v2142_v26, 0.0  ;;  %v2145_v31 = vmax.f32 %v2143_v27, 0.0 }
0x2dab   :  { %v2146_v32 = vmin.f32 %v2144_v30, 20.0  ;;  %v2147_v33 = vmin.f32 %v2145_v31, 20.0 }
0x2dad   :  { %v2150_v34 = vsel %vm100_vm1, %v2146_v32, 0.0  ;;  %v2151_v35 = vsel %vm100_vm1, %v2147_v33, 0.0 }
0x2dae   :  { %v2152_v36 = vadd.f32 %v2151_v35, %v2150_v34 }
0x2db0   :  { %v2153_v37 = vrot.slane %v2152_v36, 4 }
0x2db2   :  { %v2154_v38 = vadd.f32 %v2153_v37, %v2152_v36 }
0x2db4   :  { %v2155_v39 = vrot.slane %v2154_v38, 2 }
0x2db6   :  { %v2156_v40 = vadd.f32 %v2155_v39, %v2154_v38 }
0x2db8   :  { %v2157_v22 = vrot.slane %v2156_v40, 1 }
0x2dba   :  { %v2158_v41 = vadd.f32 %v2157_v22, %v2156_v40 }
0x2dbc   :  { %v2159_v42 = vmul.f32 0.0625, %v2158_v41 }
0x2dbe   :  { %v2160_v43 = vsub.f32 %v2146_v32, %v2159_v42  ;;  %v2161_v46 = vsub.f32 %v2147_v33, %v2159_v42 }
0x2dc0   :  { %v2162_v47 = vmul.f32 %v2160_v43, %v2160_v43  ;;  %v2163_v5 = vmul.f32 %v2161_v46, %v2161_v46 }
0x2dc2   :  { %v2164_v48 = vsel %vm100_vm1, %v2162_v47, 0.0  ;;  %v2165_v49 = vsel %vm100_vm1, %v2163_v5, 0.0 }
0x2dc3   :  { %v2166_v50 = vadd.f32 %v2165_v49, %v2164_v48 }
0x2dc5   :  { %v2167_v29 = vrot.slane %v2166_v50, 4 }
0x2dc7   :  { %v2168_v51 = vadd.f32 %v2167_v29, %v2166_v50 }
0x2dc9   :  { %v2169_v52 = vrot.slane %v2168_v51, 2 }
0x2dcb   :  { %v2170_v53 = vadd.f32 %v2169_v52, %v2168_v51 }
0x2dcd   :  { %v2171_v45 = vrot.slane %v2170_v53, 1 }
0x2dcf   :  { %v2172_v28 = vadd.f32 %v2171_v45, %v2170_v53 }
0x2dd1   :  { %v2173_v54 = vmul.f32 0.0625, %v2172_v28 }
0x2dd3   :  { %v2174_v55 = vadd.f32 1e-05, %v2173_v54 }
0x2dd5   :  { %2947 = vrsqrt.f32 %v2174_v55 }
0x2ddf   :  { %v2948_v4 = vpop.eup %2947 }
0x2de0   :  { %v2176_v57 = vmul.f32 %v2948_v4, %v2160_v43  ;;  %v2177_v58 = vmul.f32 %v2948_v4, %v2161_v46 }
0x2de2   :  { %v2184_v13 = vmul.f32 %v2375_v56, %v2176_v57  ;;  %v2185_v1 = vmul.f32 %v2375_v56, %v2177_v58 }
0x2de4   :  { %v2192_v61 = vadd.f32 %v2376_v59, %v2184_v13  ;;  %v2193_v0 = vadd.f32 %v2376_v59, %v2185_v1 }
0x2de6   :  { %2683 = vmatprep.mubr.msk.f32.mxu0 %vm100_vm1, %v2192_v61 }
0x2de7   :  { %2684 = vmatmul.mubr.msk.f32.vlgmr.msra.gmra.mrb[18].mxu0 %vm100_vm1, %v2193_v0 }
0x2eba   :  { %v2685_v24 = vpop.f32.mrb[18].mxu0 }
0x2ebb   :  { %v2270_v62 = vpop.f32.mrb[19].mxu0  ;;  %v2283_v63 = vsel %vm2279_vm12, %v2685_v24, -inf }
0x2ebc   :  { %2284 = vmax.xlane.f32.xlu1 %v2283_v63  ;;  %v2280_v19 = vsel %vm2279_vm12, %v2270_v62, -inf }
0x2ebd   :  { %2281 = vmax.xlane.f32.xlu0 %v2280_v19 }
0x2f49   :  { %v2285_v2 = vpop.xlane.xlu1 %2284 }
0x2f4a   :  { %v2287_v3 = vsub.f32 %v2685_v24, %v2285_v2  ;;  %v2282_v6 = vpop.xlane.xlu0 %2281 }
0x2f4b   :  { %v2286_v7 = vsub.f32 %v2270_v62, %v2282_v6 }
0x2f4c   :  { %v2290_v44 = vmul.f32 1.442695, %v2287_v3 }
0x2f4d   :  { %v2288_v8 = vmul.f32 1.442695, %v2286_v7 }
0x2f4f   :  { %2949 = vpow2.f32 %v2288_v8 }
0x2f50   :  { %2951 = vpow2.f32 %v2290_v44 }
0x2f59   :  { %v2950_v10 = vpop.eup %2949 }
0x2f5a   :  { %v2292_v11 = vsel %vm2279_vm12, %v2950_v10, 0.0  ;;  %v2952_v23 = vpop.eup %2951 }
0x2f5b   :  { %2293 = vadd.xlane.f32.xlu0 %v2292_v11  ;;  %v2295_v12 = vsel %vm2279_vm12, %v2952_v23, 0.0 }
0x2f5f   :  { %2296 = vadd.xlane.f32.xlu0 %v2295_v12 }
0x2fe8   :  { %v2294_v9 = vpop.xlane.xlu0 %2293 }
0x2fe9   :  { %2953 = vrcp.f32 %v2294_v9 }
0x2fea   :  { %2955 = vlog2.f32 %v2294_v9 }
0x2fec   :  { %v2297_v15 = vpop.xlane.xlu0 %2296 }
0x2fed   :  { %2957 = vrcp.f32 %v2297_v15 }
0x2fee   :  { %2959 = vlog2.f32 %v2297_v15 }
0x2ff3   :  { %v2954_v14 = vpop.eup %2953 }
0x2ff4   :  { %v2956_v16 = vpop.eup %2955  ;;  %v2299_v17 = vmul.f32 %v2954_v14, %v2950_v10 }
0x2ff5   :  { %v2305_v18 = vmul.f32 0.6931472, %v2956_v16 }
0x2ff6   :  { %2302 = vst.msk [vmem:[%s3618_s14] sm:$0xff] %vm2279_vm12, %v2299_v17 }
0x2ff7   :  { %v2958_v20 = vpop.eup %2957  ;;  %v2308_v21 = vsub.f32 %v2286_v7, %v2305_v18 }
0x2ff8   :  { %v2960_v60 = vpop.eup %2959  ;;  %v2301_v25 = vmul.f32 %v2958_v20, %v2952_v23 }
0x2ff9   :  { %2310 = vst.msk [vmem:[#allocation10] sm:$0xff] %vm2279_vm12, %v2308_v21  ;;  %v2307_v26 = vmul.f32 0.6931472, %v2960_v60 }
0x2ffa   :  { %2303 = vst.msk [vmem:[%s3618_s14 + $0x8] sm:$0xff] %vm2279_vm12, %v2301_v25 }
0x2ffb   :  { %v2309_v27 = vsub.f32 %v2287_v3, %v2307_v26 }
0x2ffd   :  { %2311 = vst.msk [vmem:[#allocation10 + $0x8] sm:$0xff] %vm2279_vm12, %v2309_v27 }
0x2ffe   :  { %3038 = shalt.err (!%p3035_p0)
}
0x2fff   :  { %s3039_s17 = scalar_lea.hbm %s3617_s13, 256 }
0x3000   :  { %p3040_p1 = scmp.ne.s32.totalorder %s3617_s13, %s3039_s17  ;;  %p3043_p2 = scmp.lt.u32.totalorder %s3039_s17, %s3617_s13 }
0x3002   :  { %p3045_p3 = pnand %p3043_p2, %p3040_p1 }
0x3004   :  { %3048 = shalt.err (!%p3045_p3)
}
0x3005   :  { %s3064_s4 = smov 128   ;;  %s3065_s16 = smov 8  }
0x3006   :  { %2323 = dma.vmem_to_hbm [thread:$0]  %s2318_s26, 256, %s3617_s13, [#allocation6], %s3064_s4, %s3064_s4, %s3065_s16  }
0x3007   :  { %3053 = dma.done.wait [#allocation6], 256  }
0x3008   :  { %3054 = vsyncadd [#allocation6], 4294967040 }
0x3009   :  { %2331 = vsyncpa [#allocation5], 1 }
0x300a   :  { %2332 = vsyncpa [#allocation8], 1 }
0x300b   :  { %2333 = vsyncpa [#allocation6], 1 }

</bundles_post_ra>
